<compile_context>
chip_gen: v6e
topology: v6e:2x2x1
jax: 0.10.0
libtpu: 0.0.40
codegen_flags: <defaults>
</compile_context>

<pallas_src>
import functools

import jax
import jax.numpy as jnp
from jax.experimental import pallas as pl
from jax.experimental.pallas import tpu as pltpu

LANES = 128                 # TPU lane width; feature / hidden dims padded to this
MLP_H = 32                  # MLP hidden width of the original module
OUT_DIM = 2                 # critic output width
MLP_ROWS = 3 * LANES + 8    # packed MLP-param buffer rows: [w1 | w2 | w3 | b1,b2,b3, pad]


def _round_up(x, m):
    return ((x + m - 1) // m) * m


def _pad2(a, rows, cols):
    return jnp.pad(a, ((0, rows - a.shape[0]), (0, cols - a.shape[1])))


# --------------------------------------------------------------------------------------
# Kernel 1: aggregation  acc = A_hat[i,:] @ XW  ->  partial node-sum per row tile
# --------------------------------------------------------------------------------------
def gcn_agg_kernel(a_ref, xw_ref, xi_ref, bg_ref, o_ref, acc_ref, *, tk):
    k = pl.program_id(1)
    nk = pl.num_programs(1)

    @pl.when(k == 0)
    def _init_acc():
        acc_ref[...] = jnp.zeros_like(acc_ref)

    # MXU partial product: acc += A_hat[i, k] @ XW[k]  (bf16 operands, f32 accumulate).
    # XW is VMEM-resident (loaded once); slice the k-chunk in-kernel.
    off = pl.multiple_of(k * tk, tk)
    acc_ref[...] += jnp.dot(a_ref[...], xw_ref[pl.ds(off, tk), :],
                            preferred_element_type=jnp.float32)

    @pl.when(k == nk - 1)
    def _epilogue():
        # GCNConv epilogue for this row tile: relu(A_hat @ XW + b) + X, then node-sum.
        # Padded rows (A row = 0, X row = 0) each contribute exactly relu(bg); this is
        # corrected once in the MLP head kernel instead of masking per row tile.
        h = jnp.maximum(acc_ref[...] + bg_ref[...], 0.0) + xi_ref[...]
        o_ref[...] = jnp.sum(h, axis=0, keepdims=True).reshape(1, 1, LANES)


# --------------------------------------------------------------------------------------
# Kernel 2: reduce partial sums, correct for padded rows, run the 3-layer MLP head
# --------------------------------------------------------------------------------------
def mlp_head_kernel(part_ref, bg_ref, mlp_ref, o_ref, *, pad_rows):
    s = jnp.sum(part_ref[...], axis=0)                         # [1, 128]
    s = s - pad_rows * jnp.maximum(bg_ref[...], 0.0)           # exact padded-row fixup
    w1 = mlp_ref[0 * LANES:1 * LANES, :]
    w2 = mlp_ref[1 * LANES:2 * LANES, :]
    w3 = mlp_ref[2 * LANES:3 * LANES, :]
    b1 = mlp_ref[3 * LANES + 0:3 * LANES + 1, :]
    b2 = mlp_ref[3 * LANES + 1:3 * LANES + 2, :]
    b3 = mlp_ref[3 * LANES + 2:3 * LANES + 3, :]
    h1 = jnp.maximum(jnp.dot(s, w1, preferred_element_type=jnp.float32) + b1, 0.0)
    h2 = jnp.maximum(jnp.dot(h1, w2, preferred_element_type=jnp.float32) + b2, 0.0)
    o_ref[...] = jnp.dot(h2, w3, preferred_element_type=jnp.float32) + b3


def pack_mlp_params(w1, b1, w2, b2, w3, b3):
    """Pack lin1/lin2/lin3 weights+biases into one lane-dense (392, 128) buffer."""
    buf = jnp.zeros((MLP_ROWS, LANES), jnp.float32)
    buf = buf.at[0:w1.shape[0], 0:MLP_H].set(w1)                      # w1: [C, 32]
    buf = buf.at[LANES:LANES + MLP_H, 0:MLP_H].set(w2)                # w2: [32, 32]
    buf = buf.at[2 * LANES:2 * LANES + MLP_H, 0:OUT_DIM].set(w3)      # w3: [32, 2]
    buf = buf.at[3 * LANES + 0, 0:MLP_H].set(b1)
    buf = buf.at[3 * LANES + 1, 0:MLP_H].set(b2)
    buf = buf.at[3 * LANES + 2, 0:OUT_DIM].set(b3)
    return buf


def gnn_critic_forward(a_hat, x, params, *, tm=256, tk=512):
    wg, bg, w1, b1, w2, b2, w3, b3 = params
    n, c = x.shape
    assert c <= LANES  # TODO(synk): add a feature-K tile axis for in_channels > 128
    assert tk % tm == 0 and tm % 8 == 0

    # Padded node count; must be a multiple of both tm and tk.
    if n <= tm:
        np_, tk_ = tm, tm
    else:
        np_, tk_ = _round_up(n, tk), tk
    ni, nk = np_ // tm, np_ // tk_

    # Lane-dense, zero-padded operands.  bf16 for the N^2 adjacency and the contraction
    # operand XW = X @ Wg (precomputed here; MXU accumulates in f32 inside the kernel).
    a_pad = _pad2(a_hat, np_, np_).astype(jnp.bfloat16)
    x_pad = _pad2(x, np_, LANES)                                   # f32 residual
    wg_pad = _pad2(wg, LANES, LANES)
    xw_pad = jnp.dot(x_pad, wg_pad).astype(jnp.bfloat16)           # [np_, 128] bf16
    bg_pad = _pad2(bg[None, :], 1, LANES)
    mlp_pad = pack_mlp_params(w1, b1, w2, b2, w3, b3)
    # TODO(synk): int8+scale A_hat on v5e/v6e (fp8 on v7x) would halve the dominant
    # stream again; needs end-to-end accuracy validation first.

    # VMEM budget from actual buffer sizes (conservatively 2 buffers per input).
    vmem_need = (2 * tm * tk_ * 2            # A_hat tile, bf16, double-buffered
                 + 2 * np_ * LANES * 2       # resident XW, bf16
                 + 2 * tm * LANES * 4        # X residual tile, f32
                 + tm * LANES * 4            # acc scratch
                 + 8 * LANES * 4)            # bg + output block
    vmem_limit = min(max(int(1.5 * vmem_need) + (2 << 20), 16 << 20), 64 << 20)
    # TODO(synk): for very large np_ where resident bf16 XW (~np_*256 B x2) crowds v7x's
    # 64 MiB VMEM, fall back to streaming XW with tk >= 1024.
    # TODO(synk): pipeline_mode=pl.Buffered(1) on the constant-index XW/bg specs would
    # drop their second buffer (pure VMEM hygiene).

    flops = 2 * np_ * np_ * LANES
    bytes_accessed = (a_pad.size * 2 + xw_pad.size * 2 + x_pad.size * 4
                      + bg_pad.size * 4 + ni * LANES * 4)

    partial = pl.pallas_call(
        functools.partial(gcn_agg_kernel, tk=tk_),
        out_shape=jax.ShapeDtypeStruct((ni, 1, LANES), jnp.float32),
        grid_spec=pltpu.PrefetchScalarGridSpec(
            num_scalar_prefetch=0,
            grid=(ni, nk),                                          # reduction axis last
            in_specs=[
                pl.BlockSpec((tm, tk_), lambda i, k: (i, k)),       # A_hat tile (bf16)
                pl.BlockSpec((np_, LANES), lambda i, k: (0, 0)),    # XW, VMEM-resident
                pl.BlockSpec((tm, LANES), lambda i, k: (i, 0)),     # X residual tile
                pl.BlockSpec((1, LANES), lambda i, k: (0, 0)),      # bg
            ],
            out_specs=pl.BlockSpec((1, 1, LANES), lambda i, k: (i, 0, 0)),
            scratch_shapes=[pltpu.VMEM((tm, LANES), jnp.float32)],  # A@XW row-tile acc
        ),
        # Row axis carries no cross-tile state any more -> 'parallel' (v7x megacore);
        # k is the matmul reduction -> 'arbitrary'.
        compiler_params=pltpu.CompilerParams(
            dimension_semantics=("parallel", "arbitrary"),
            vmem_limit_bytes=vmem_limit,
        ),
        cost_estimate=pl.CostEstimate(flops=int(flops), transcendentals=0,
                                      bytes_accessed=int(bytes_accessed)),
    )(a_pad, xw_pad, x_pad, bg_pad)

    out = pl.pallas_call(
        functools.partial(mlp_head_kernel, pad_rows=float(np_ - n)),
        out_shape=jax.ShapeDtypeStruct((1, LANES), jnp.float32),
        grid_spec=pltpu.PrefetchScalarGridSpec(
            num_scalar_prefetch=0,
            grid=(1,),
            in_specs=[
                pl.BlockSpec((ni, 1, LANES), lambda i: (0, 0, 0)),  # partial node-sums
                pl.BlockSpec((1, LANES), lambda i: (0, 0)),         # bg (for correction)
                pl.BlockSpec((MLP_ROWS, LANES), lambda i: (0, 0)),  # packed MLP head
            ],
            out_specs=pl.BlockSpec((1, LANES), lambda i: (0, 0)),
        ),
        compiler_params=pltpu.CompilerParams(dimension_semantics=("arbitrary",)),
    )(partial, bg_pad, mlp_pad)

    return out[0, :OUT_DIM]


def build_norm_adj(edge_index, num_nodes):
    """D^{-1/2} (A + I) D^{-1/2}  (PyG GCNConv default normalization).

    Scatter-ADD so duplicate edges sum (matches PyG message summation); assumes
    edge_index has no pre-existing self-loops (they are added here).
    """
    src, dst = edge_index[0], edge_index[1]
    A = jnp.zeros((num_nodes, num_nodes), jnp.float32).at[dst, src].add(1.0)
    A = A + jnp.eye(num_nodes, dtype=jnp.float32)
    deg = jnp.sum(A, axis=1)
    dinv = jax.lax.rsqrt(deg)
    return dinv[:, None] * A * dinv[None, :]
    # TODO(synk): for large sparse graphs, replace this dense O(N^2) path with an
    # edge-list/CSR gather-scatter Pallas kernel (PrefetchScalarGridSpec + make_async_copy).


def init_params(key, in_channels):
    ks = jax.random.split(key, 8)
    s = 0.1
    wg = s * jax.random.normal(ks[0], (in_channels, in_channels), jnp.float32)
    bg = s * jax.random.normal(ks[1], (in_channels,), jnp.float32)
    w1 = s * jax.random.normal(ks[2], (in_channels, MLP_H), jnp.float32)
    b1 = s * jax.random.normal(ks[3], (MLP_H,), jnp.float32)
    w2 = s * jax.random.normal(ks[4], (MLP_H, MLP_H), jnp.float32)
    b2 = s * jax.random.normal(ks[5], (MLP_H,), jnp.float32)
    w3 = s * jax.random.normal(ks[6], (MLP_H, OUT_DIM), jnp.float32)
    b3 = s * jax.random.normal(ks[7], (OUT_DIM,), jnp.float32)
    return (wg, bg, w1, b1, w2, b2, w3, b3)


def reference_forward_f32(a_hat, x, params):
    wg, bg, w1, b1, w2, b2, w3, b3 = params
    out = jnp.maximum(a_hat @ (x @ wg) + bg, 0.0)
    s = jnp.sum(out + x, axis=0)
    h1 = jnp.maximum(s @ w1 + b1, 0.0)
    h2 = jnp.maximum(h1 @ w2 + b2, 0.0)
    return h2 @ w3 + b3


def reference_forward_mirrored(a_hat, x, params):
    """Mirrors the kernel's arithmetic: XW precomputed in f32 then cast to bf16,
    bf16 A_hat @ XW with f32 accumulation, everything else f32."""
    wg, bg, w1, b1, w2, b2, w3, b3 = params
    xw = jnp.dot(x, wg).astype(jnp.bfloat16)
    ax = jnp.dot(a_hat.astype(jnp.bfloat16), xw, preferred_element_type=jnp.float32)
    out = jnp.maximum(ax + bg, 0.0)
    s = jnp.sum(out + x, axis=0)
    h1 = jnp.maximum(s @ w1 + b1, 0.0)
    h2 = jnp.maximum(h1 @ w2 + b2, 0.0)
    return h2 @ w3 + b3


if __name__ == "__main__":
    key = jax.random.PRNGKey(0)
    N = 600          # nodes (not a tile multiple -> exercises padding + row correction)
    C = 8            # in_channels

    k_x, k_p = jax.random.split(key)
    x = jax.random.normal(k_x, (N, C), jnp.float32)

    # deterministic ring graph (both directions), no duplicate edges / self-loops
    src = jnp.arange(N, dtype=jnp.int32)
    dst = (src + 1) % N
    edge_index = jnp.stack([jnp.concatenate([src, dst]),
                            jnp.concatenate([dst, src])], axis=0)     # [2, 2N]

    a_hat = build_norm_adj(edge_index, N)
    params = init_params(k_p, C)

    y = gnn_critic_forward(a_hat, x, params)
    y = jax.block_until_ready(y)
    assert y.shape == (OUT_DIM,)

    # Tight check against a reference using the same operand precision as the kernel.
    y_mirror = reference_forward_mirrored(a_hat, x, params)
    assert jnp.allclose(y, y_mirror, atol=1e-2, rtol=1e-3), (y, y_mirror)

    # Loose sanity check against the pure-f32 original-order forward
    # (difference is only the bf16 operand rounding of the aggregation matmul).
    y_f32 = reference_forward_f32(a_hat, x, params)
    rel = float(jnp.linalg.norm(y - y_f32) / jnp.maximum(jnp.linalg.norm(y_f32), 1.0))
    assert rel < 0.05, (y, y_f32, rel)

    print("KERNEL_OK")
</pallas_src>

<mosaic_0001>
module attributes {stable_mosaic.version = 11 : i64} {
  func.func @gcn_agg_kernel(%arg0: i32, %arg1: i32, %arg2: memref<256x512xbf16, #tpu.memory_space<vmem>>, %arg3: memref<1024x128xbf16, #tpu.memory_space<vmem>>, %arg4: memref<256x128xf32, #tpu.memory_space<vmem>>, %arg5: memref<1x128xf32, #tpu.memory_space<vmem>>, %arg6: memref<1x1x128xf32, #tpu.memory_space<vmem>>, %arg7: memref<256x128xf32, #tpu.memory_space<vmem>>) attributes {dimension_semantics = [#tpu.dimension_semantics<parallel>, #tpu.dimension_semantics<arbitrary>], iteration_bounds = array<i64: 4, 2>, scalar_prefetch = 0 : i64, scratch_operands = 1 : i64, tpu.core_type = #tpu.core_type<tc>, window_params = [{transform_indices = @transform_0, window_bounds = array<i64: 256, 512>}, {pipeline_mode = #tpu.pipeline_mode<synchronous>, transform_indices = @transform_1, window_bounds = array<i64: 1024, 128>}, {transform_indices = @transform_2, window_bounds = array<i64: 256, 128>}, {pipeline_mode = #tpu.pipeline_mode<synchronous>, transform_indices = @transform_3, window_bounds = array<i64: 1, 128>}, {transform_indices = @transform_4, window_bounds = array<i64: 1, 1, 128>}]} {
    %c0_i32 = arith.constant 0 : i32
    %0 = arith.cmpi eq, %arg1, %c0_i32 : i32
    %1 = arith.extui %0 : i1 to i32
    %c0_i32_0 = arith.constant 0 : i32
    %2 = arith.cmpi ne, %1, %c0_i32_0 : i32
    scf.if %2 {
      %cst_8 = arith.constant 0.000000e+00 : f32
      %15 = vector.broadcast %cst_8 : f32 to vector<256x128xf32>
      %c0_9 = arith.constant 0 : index
      %c0_10 = arith.constant 0 : index
      %16 = vector.load %arg7[%c0_9, %c0_10] : memref<256x128xf32, #tpu.memory_space<vmem>>, vector<256x128xf32>
      tpu.vector_store %arg7[%c0_9, %c0_10], %15 {strides = array<i32>} : memref<256x128xf32, #tpu.memory_space<vmem>>, vector<256x128xf32>,
    } else {
    }
    %c512_i32 = arith.constant 512 : i32
    %3 = arith.muli %arg1, %c512_i32 : i32
    %4 = tpu.assume_multiple %3, 512 : i32
    %c0 = arith.constant 0 : index
    %c0_1 = arith.constant 0 : index
    %5 = vector.load %arg7[%c0, %c0_1] : memref<256x128xf32, #tpu.memory_space<vmem>>, vector<256x128xf32>
    %c0_2 = arith.constant 0 : index
    %c0_3 = arith.constant 0 : index
    %6 = vector.load %arg2[%c0_2, %c0_3] : memref<256x512xbf16, #tpu.memory_space<vmem>>, vector<256x512xbf16>
    %7 = arith.index_cast %4 : i32 to index
    %c0_4 = arith.constant 0 : index
    %8 = vector.load %arg3[%7, %c0_4] : memref<1024x128xbf16, #tpu.memory_space<vmem>>, vector<512x128xbf16>
    %cst = arith.constant dense<0.000000e+00> : vector<256x128xf32>
    %9 = tpu.matmul %6, %8, %cst {dimension_numbers = #tpu.dot_dimension_numbers<[1], [0], [0], [1], [0, 0, 1, 1], [], []>} : vector<256x512xbf16>, vector<512x128xbf16>, vector<256x128xf32> -> vector<256x128xf32>
    %10 = arith.addf %5, %9 : vector<256x128xf32>
    %c0_5 = arith.constant 0 : index
    %c0_6 = arith.constant 0 : index
    %11 = vector.load %arg7[%c0_5, %c0_6] : memref<256x128xf32, #tpu.memory_space<vmem>>, vector<256x128xf32>
    tpu.vector_store %arg7[%c0_5, %c0_6], %10 {strides = array<i32>} : memref<256x128xf32, #tpu.memory_space<vmem>>, vector<256x128xf32>,
    %c1_i32 = arith.constant 1 : i32
    %12 = arith.cmpi eq, %arg1, %c1_i32 : i32
    %13 = arith.extui %12 : i1 to i32
    %c0_i32_7 = arith.constant 0 : i32
    %14 = arith.cmpi ne, %13, %c0_i32_7 : i32
    scf.if %14 {
      %c0_8 = arith.constant 0 : index
      %c0_9 = arith.constant 0 : index
      %15 = vector.load %arg7[%c0_8, %c0_9] : memref<256x128xf32, #tpu.memory_space<vmem>>, vector<256x128xf32>
      %c0_10 = arith.constant 0 : index
      %c0_11 = arith.constant 0 : index
      %16 = vector.load %arg5[%c0_10, %c0_11] : memref<1x128xf32, #tpu.memory_space<vmem>>, vector<1x128xf32>
      %17 = vector.broadcast %16 : vector<1x128xf32> to vector<256x128xf32>
      %18 = arith.addf %15, %17 : vector<256x128xf32>
      %cst_12 = arith.constant 0.000000e+00 : f32
      %19 = vector.broadcast %cst_12 : f32 to vector<256x128xf32>
      %20 = arith.maximumf %18, %19 : vector<256x128xf32>
      %c0_13 = arith.constant 0 : index
      %c0_14 = arith.constant 0 : index
      %21 = vector.load %arg4[%c0_13, %c0_14] : memref<256x128xf32, #tpu.memory_space<vmem>>, vector<256x128xf32>
      %22 = arith.addf %20, %21 : vector<256x128xf32>
      %cst_15 = arith.constant dense<0.000000e+00> : vector<128xf32>
      %23 = vector.multi_reduction <add>, %22, %cst_15 [0] : vector<256x128xf32> to vector<128xf32>
      %24 = vector.shape_cast %23 : vector<128xf32> to vector<1x128xf32>
      %25 = vector.shape_cast %24 : vector<1x128xf32> to vector<1x1x128xf32>
      %c0_16 = arith.constant 0 : index
      %c0_17 = arith.constant 0 : index
      %c0_18 = arith.constant 0 : index
      %26 = vector.load %arg6[%c0_16, %c0_17, %c0_18] : memref<1x1x128xf32, #tpu.memory_space<vmem>>, vector<1x1x128xf32>
      tpu.vector_store %arg6[%c0_16, %c0_17, %c0_18], %25 {strides = array<i32>} : memref<1x1x128xf32, #tpu.memory_space<vmem>>, vector<1x1x128xf32>,
    } else {
    }
    return
  }
  func.func @transform_0(%arg0: i32, %arg1: i32) -> (i32, i32) {
    %c0_i32 = arith.constant 0 : i32
    return %arg0, %arg1 : i32, i32
  }
  func.func @transform_1(%arg0: i32, %arg1: i32) -> (i32, i32) {
    %c0_i32 = arith.constant 0 : i32
    %c0_i32_0 = arith.constant 0 : i32
    %c0_i32_1 = arith.constant 0 : i32
    return %c0_i32, %c0_i32_0 : i32, i32
  }
  func.func @transform_2(%arg0: i32, %arg1: i32) -> (i32, i32) {
    %c0_i32 = arith.constant 0 : i32
    %c0_i32_0 = arith.constant 0 : i32
    return %arg0, %c0_i32 : i32, i32
  }
  func.func @transform_3(%arg0: i32, %arg1: i32) -> (i32, i32) {
    %c0_i32 = arith.constant 0 : i32
    %c0_i32_0 = arith.constant 0 : i32
    %c0_i32_1 = arith.constant 0 : i32
    return %c0_i32, %c0_i32_0 : i32, i32
  }
  func.func @transform_4(%arg0: i32, %arg1: i32) -> (i32, i32, i32) {
    %c0_i32 = arith.constant 0 : i32
    %c0_i32_0 = arith.constant 0 : i32
    %c0_i32_1 = arith.constant 0 : i32
    return %arg0, %c0_i32, %c0_i32_0 : i32, i32, i32
  }
}

</mosaic_0001>

<bundles_post_ra>
// kernel: tpu_custom_call.1
= control target key start
LH: loop header
LB: loop body
LE: loop exit
PB: predicated region body
PF: predicated region fallthrough
CT: control target
= control target key end

     0   :  { %s3082_s0 = inlined_call_operand.hbm [shape: bf16[1024,1024], index: 0, kind: input, shape index: {}]   ;;  %s3083_s1 = inlined_call_operand.hbm [shape: bf16[1024,128], index: 1, kind: input, shape index: {}]   ;;  %s3084_s2 = inlined_call_operand.hbm [shape: f32[1024,128], index: 2, kind: input, shape index: {}]   ;;  %s3085_s3 = inlined_call_operand.hbm [shape: f32[1,128], index: 3, kind: input, shape index: {}]   ;;  %s3086_s4 = inlined_call_operand.hbm [shape: f32[4,1,128], index: 4, kind: output, shape index: {}]  }
   0x1   :  { %3101 = sst [smem:[#allocation24_spill]] %s3083_s1 }
   0x2   :  { %3102 = sst [smem:[#allocation25_spill]] %s3086_s4 }
   0x3   :  { %9 = vsyncpa [#allocation4], 0 }
   0x4   :  { %11 = vsyncpa [#allocation4 + $0x1], 0 }
   0x5   :  { %12 = vsyncpa [#allocation7], 0 }
   0x6   :  { %13 = vsyncpa [#allocation5], 0 }
   0x7   :  { %15 = vsyncpa [#allocation5 + $0x1], 0  ;;  %s2635_s15 = smov 0   ;;  %s2637_s16 = smov 0  }
   0x8   :  { %s2639_s17 = smov 0   ;;  %s2641_s18 = smov 0  }
   0x9   :  { %s2643_s19 = smov 0   ;;  %s2645_s20 = smov 0  }
   0xa   :  { %s2647_s21 = smov 0   ;;  %s2649_s22 = smov 0  }
   0xb   :  { %s2651_s23 = smov 0   ;;  %s2653_s24 = smov 0  }
   0xc   :  { %s2655_s25 = smov 0  }
   0xd LB: > { %3103 = sst [smem:[#allocation16_spill]] %s2555_s15  ;;  %s2689_s26 = sadd.s32 4294967295, %s2595_s25   ;;  %s2595_s25 = sphi %s2655_s25, %s21_s25   ;;  %s2591_s24 = sphi %s2653_s24, %s3150_s24   ;;  %s2587_s23 = sphi %s2651_s23, %s3149_s23   ;;  %s2583_s22 = sphi %s2649_s22, %s3148_s22   ;;  %s2579_s21 = sphi %s2647_s21, %s3147_s21   ;;  %s2575_s20 = sphi %s2645_s20, %s3146_s20   ;;  %s2571_s19 = sphi %s2643_s19, %s3145_s19   ;;  %s2567_s18 = sphi %s2641_s18, %s3144_s18   ;;  %s2563_s17 = sphi %s2639_s17, %s3143_s17   ;;  %s2559_s16 = sphi %s2637_s16, %s3142_s16   ;;  %s2555_s15 = sphi %s2635_s15, %s3141_s15  }
   0xe   : > { %3104 = sst [smem:[#allocation17_spill]] %s2579_s21  ;;  %s1743_s27 = sadd.s32 4294967294, %s2595_s25  }
   0xf   : > { %3105 = sst [smem:[#allocation18_spill]] %s2583_s22  ;;  %p55_p0 = scmp.ne.s32.totalorder %s2571_s19, %s2567_s18 }
  0x10   : > { %p3097_p1 = scmp.eq.s32.totalorder %s2689_s26, 0  ;;  %p102_p2 = scmp.ne.s32.totalorder %s2559_s16, %s2555_s15 }
  0x11   : > { %p153_p5 = scmp.eq.s32.totalorder %s1743_s27, 7  ;;  %p1744_p7 = scmp.ge.s32.totalorder %s2595_s25, 1 }
  0x12   : > { %p2699_p4 = por %p3097_p1, %p55_p0  ;;  %p2705_p6 = por %p102_p2, %p3097_p1 }
  0x13   : > { %p2710_p8 = por %p153_p5, %p102_p2  ;;  %p160_p9 = scmp.lt.s32.totalorder %s2595_s25, 9 }
  0x14   : > { %s3106_s28 = scalar_select %p2699_p4, 1, 0 }
  0x15   : > { %s3108_s29 = scalar_select %p2705_p6, 1, 0 }
  0x16   : > { %3107 = sst [smem:[#allocation19_spill]] %s3106_s28  ;;  %p2715_p10 = pnand %p1744_p7, %p160_p9 }
  0x17   : > { %3109 = sst [smem:[#allocation20_spill]] %s3108_s29  ;;  %s2597_s6 = smov [#allocation6]  }
  0x18   : > { %s3110_s30 = scalar_select %p2710_p8, 1, 0 }
  0x19   : > { %s172_s7 = sshll.u32 %s2597_s6, 4  ;;  %p2105_p11 = pneg %p2715_p10  ;;  %s173_s7 = int_to_ptr.vmem [resolvable:$true] %s172_s7 }
  0x1a   : > { %3111 = sst [smem:[#allocation21_spill]] %s3110_s30  ;;  %s2366_s9 = scalar_lea.vmem %s173_s7, 8192 }
  0x1b   : > { %p2723_p12 = pnand %p2105_p11, %p3097_p1  ;;  %p2367_p0 = scmp.ne.s32.totalorder %s173_s7, %s2366_s9 }
  0x1c   : > { %p2374_p7 = scmp.lt.s32.totalorder %s173_s7, %s173_s7  ;;  %p2375_p9 = scmp.lt.s32.totalorder %s2366_s9, %s2366_s9 }
  0x1d   : > { %p3099_p13 = pneg %p2723_p12 }
  0x1e   : > { %p2376_p3 = por %p2375_p9, %p2374_p7 }
  0x1f   : > { %p2369_p2 = pnand %p2367_p0, %p3099_p13 }
  0x21   : > { %p2370_p5 = pneg %p2369_p2 }
  0x23   : > { %p2377_p8 = pnand %p2376_p3, %p2370_p5 }
  0x25   : > { %2380 = shalt.err (!%p2377_p8)
}
  0x26   : > { %s2598_s10 = smov 64   ;;  %s2599_s11 = smov 4  }
  0x27   : > { %s3114_s1 = sld [smem:[#allocation24_spill]]  ;;  %s30_s14 = sadd.s32 1, %s2587_s23 }
  0x28   : > { %p31_p3 = scmp.ge.s32.totalorder %s30_s14, 2  ;;  %s33_s18 = sadd.s32 1, %s2591_s24 }
  0x29   : > { %s42_s27 = sadd.s32 1, %s2575_s20  ;;  %p49_p8 = scmp.ne.s32.totalorder %s2575_s20, %s2571_s19 }
  0x2a   : > { %s3152_s14 = smov (%p31_p3, %s30_s14), 0  ;;  %s3154_s18 = smov (!%p31_p3, %s33_s18), %s2591_s24 }
  0x2b   : > { %3115 = sst [smem:[#allocation22_spill]] %s3152_s14  ;;  %s38_s6 = ssub.s32 %s2587_s23, %s3152_s14 }
  0x2c   : > { %p3098_p11 = scmp.eq.s32.totalorder %s2595_s25, 0  ;;  %p35_p0 = scmp.ge.s32.totalorder %s3154_s18, 4 }
  0x2d   : > { %2108 = dma.hbm_to_vmem [thread:$0]  (!%p2723_p12), %s3114_s1, 8192, %s173_s7, [#allocation7], %s2598_s10, %s2598_s10, %s2599_s11  }
  0x2e   : > { %p2125_p2 = scmp.lt.s32.totalorder %s2595_s25, 8  ;;  %p2751_p5 = por %p3098_p11, %p49_p8 }
  0x2f   : > { %s197_s9 = sand.u32 1, %s2595_s25   ;;  %s3156_s18 = smov (%p35_p0, %s3154_s18), 0 }
  0x30   : > { %3117 = sst [smem:[#allocation23_spill]] %s3156_s18  ;;  %s199_s10 = sand.u32 1, %s2575_s20  }
  0x31   : > { %s2761_s11 = ssub.s32 %s2591_s24, %s3156_s18  ;;  %s1748_s12 = sshll.u32 %s199_s10, 9 }
  0x32   : > { %s39_s13 = sor.u32 %s38_s6, %s2761_s11  ;;  %s1750_s1 = sshll.u32 %s2587_s23, 2 }
  0x33   : > { %p40_p9 = scmp.eq.s32.totalorder %s39_s13, 0  ;;  %s1865_s14 = sshll.u32 %s2591_s24, 8 }
  0x34   : > { %s208_s15 = sadd.s32 %s1865_s14, %s1750_s1  ;;  %s201_s4 = scalar_lea.vmem [#allocation3], %s1748_s12 }
  0x35   : > { %s2768_s30 = scalar_select %p40_p9, %s2575_s20, %s42_s27  }
  0x36   : > { %s211_s22 = sshll.u32 %s201_s4, 4  ;;  %s1752_s21 = sshll.u32 %s208_s15, 6  ;;  %s212_s22 = int_to_ptr.vmem [resolvable:$true] %s211_s22 }
  0x37   : > { %s210_s18 = scalar_lea.hbm %s3082_s0, %s1752_s21  ;;  %p2777_p3 = pnand %p2125_p2, %p2751_p5 }
  0x38   : > { %s2781_s6 = scalar_lea.sflag [#allocation4], %s197_s9  ;;  %s2394_s1 = scalar_lea.vmem %s212_s22, 8192 }
  0x39   : > { %p2383_p8 = pneg %p2777_p3  ;;  %p2395_p0 = scmp.ne.s32.totalorder %s212_s22, %s2394_s1 }
  0x3a   : > { %s2600_s4 = smov [#allocation3]  }
  0x3b   : > { %p2397_p9 = pnand %p2395_p0, %p2383_p8  ;;  %s2399_s15 = sshll.u32 %s2600_s4, 4  ;;  %s2400_s15 = int_to_ptr.vmem [resolvable:$false] %s2399_s15 }
  0x3c   : > { %s2401_s28 = scalar_lea.vmem %s2400_s15, 16384  ;;  %p2402_p11 = scmp.lt.s32.totalorder %s212_s22, %s2400_s15 }
  0x3d   : > { %p2398_p1 = pneg %p2397_p9  ;;  %p2403_p7 = scmp.lt.s32.totalorder %s2401_s28, %s2394_s1 }
  0x3f   : > { %p2404_p13 = por %p2403_p7, %p2402_p11 }
  0x41   : > { %p2405_p5 = pnand %p2404_p13, %p2398_p1 }
  0x43   : > { %2408 = shalt.err (!%p2405_p5)
}
  0x44   : > { %s2601_s21 = smov 512   ;;  %s2602_s29 = smov 256  }
  0x45   : > { %s2603_s14 = smov 16   ;;  %s2604_s27 = smov [#allocation9]  }
  0x46   : > { %2115 = dma.hbm_to_vmem [thread:$0]  (!%p2777_p3), %s210_s18, 8192, %s212_s22, %s2781_s6, %s2601_s21, %s2602_s29, %s2603_s14  }
  0x47   : > { %s186_s7 = sshll.u32 %s2604_s27, 4  ;;  %s89_s9 = sadd.s32 1, %s2563_s17  ;;  %s187_s7 = int_to_ptr.vmem [resolvable:$true] %s186_s7 }
  0x48   : > { %s2420_s12 = scalar_lea.vmem %s187_s7, 16  ;;  %p3119_p0 = pneg %p2723_p12 }
  0x49   : > { %p2421_p8 = scmp.ne.s32.totalorder %s187_s7, %s2420_s12  ;;  %s2427_s13 = scalar_lea.vmem %s187_s7, 32 }
  0x4a   : > { %p2428_p13 = scmp.lt.s32.totalorder %s187_s7, %s187_s7  ;;  %p2429_p7 = scmp.lt.s32.totalorder %s2427_s13, %s2420_s12 }
  0x4b   : > { %p2423_p11 = pnand %p2421_p8, %p3119_p0 }
  0x4c   : > { %p2430_p9 = por %p2429_p7, %p2428_p13 }
  0x4d   : > { %p2424_p1 = pneg %p2423_p11 }
  0x4f   : > { %p2431_p5 = pnand %p2430_p9, %p2424_p1 }
  0x51   : > { %2434 = shalt.err (!%p2431_p5)
}
  0x52   : > { %2111 = dma.hbm_to_vmem [thread:$0]  (!%p2723_p12), %s3085_s3, 16, %s187_s7, [#allocation7]  }
  0x53   : > { %p3120_p3 = scmp.eq.s32.totalorder %s2761_s11, 0  ;;  %p96_p8 = scmp.ne.s32.totalorder %s2563_s17, %s2559_s16 }
  0x54   : > { %s223_s1 = sand.u32 1, %s2563_s17   ;;  %s1866_s8 = sshll.u32 %s2591_s24, 12 }
  0x55   : > { %s2800_s18 = scalar_select %p3120_p3, %s2563_s17, %s89_s9  }
  0x56   : > { %s1753_s4 = sshll.u32 %s223_s1, 8  ;;  %p3121_p0 = scmp.eq.s32.totalorder %s2595_s25, 0 }
  0x57   : > { %p3122_p1 = scmp.eq.s32.totalorder %s2689_s26, 7  ;;  %s231_s29 = scalar_lea.hbm %s3084_s2, %s1866_s8 }
  0x58   : > { %p98_p11 = por %p96_p8, %p3121_p0  ;;  %s225_s14 = scalar_lea.vmem [#allocation8], %s1753_s4 }
  0x59   : > { %p2810_p13 = por %p3122_p1, %p96_p8  ;;  %s232_s27 = sshll.u32 %s225_s14, 4  ;;  %s233_s27 = int_to_ptr.vmem [resolvable:$true] %s232_s27 }
  0x5a   : > { %p2819_p12 = pnand %p2125_p2, %p98_p11  ;;  %s2448_s7 = scalar_lea.vmem %s233_s27, 4096 }
  0x5b   : > { %s3123_s15 = scalar_select %p2810_p13, 1, 0 }
  0x5c   : > { %p2437_p7 = pneg %p2819_p12  ;;  %p2449_p9 = scmp.ne.s32.totalorder %s233_s27, %s2448_s7 }
  0x5d   : > { %s2605_s9 = smov [#allocation8]  }
  0x5e   : > { %p2451_p5 = pnand %p2449_p9, %p2437_p7  ;;  %s2453_s12 = sshll.u32 %s2605_s9, 4  ;;  %s2454_s12 = int_to_ptr.vmem [resolvable:$false] %s2453_s12 }
  0x5f   : > { %s2455_s13 = scalar_lea.vmem %s2454_s12, 8192  ;;  %p2456_p8 = scmp.lt.s32.totalorder %s233_s27, %s2454_s12 }
  0x60   : > { %p2452_p3 = pneg %p2451_p5  ;;  %p2457_p0 = scmp.lt.s32.totalorder %s2455_s13, %s2448_s7 }
  0x62   : > { %p2458_p1 = por %p2457_p0, %p2456_p8 }
  0x64   : > { %p2459_p13 = pnand %p2458_p1, %p2452_p3 }
  0x66   : > { %2462 = shalt.err (!%p2459_p13)
}
  0x67   : > { %s2606_s10 = smov 128   ;;  %s2607_s22 = smov 8  }
  0x68   : > { %2118 = dma.hbm_to_vmem [thread:$0]  (!%p2819_p12), %s231_s29, 4096, %s233_s27, %s2781_s6, %s2606_s10, %s2606_s10, %s2607_s22  }
  0x69   : > { %244 = sbr.rel (%p2715_p10) target bundleno = 631 (0x277), region = 36  ;;  %s246_s4 = sand.u32 (!%p2715_p10), 1, %s2689_s26  }
  0x6a   : > { %s248_s8 = sand.u32 (!%p2715_p10), 1, %s2571_s19   ;;  %s247_s21 = scalar_lea.sflag (!%p2715_p10), [#allocation4], %s246_s4 }
  0x6b   : > { %s1757_s28 = sshll.u32 (!%p2715_p10), %s248_s8, 9 }
  0x6c   : > { %s2832_s14 = scalar_lea.vmem (!%p2715_p10), [#allocation3], %s1757_s28 }
  0x6e   : > { %2534 = dma.done.wait (%p2699_p4), %s247_s21, 8192  }
  0x6f   : > { %2536 = vsyncadd (%p2699_p4), %s247_s21, 4294959104  ;;  %p3126_p2 = scmp.eq.s32.totalorder %s2689_s26, 0 }
  0x71   : > { %2538 = dma.done.wait (%p3126_p2), [#allocation7], 8192   ;;  %p3127_p11 = pmov %p3126_p2 }
  0x72   : > { %s2843_s6 = sand.u32 1, %s2559_s16  }
  0x73   : > { %2540 = vsyncadd (%p3127_p11), [#allocation7], 4294959104  ;;  %s1759_s29 = sshll.u32 %s2843_s6, 8 }
  0x74   : > { %s2846_s27 = scalar_lea.vmem [#allocation8], %s1759_s29 }
  0x75   : > { %2542 = dma.done.wait (%p2705_p6), %s247_s21, 4096  }
  0x76   : > { %2544 = vsyncadd (%p2705_p6), %s247_s21, 4294963200  ;;  %p3129_p4 = pmov %p3126_p2 }
  0x77   : > { %p3130_p10 = pmov %p3126_p2 }
  0x78   : > { %2546 = dma.done.wait (%p3129_p4), [#allocation7], 16  }
  0x79   : > { %2548 = vsyncadd (%p3130_p10), [#allocation7], 4294967280  ;;  %s295_s11 = scalar_lea.vmem [#allocation10], %s2843_s6  ;;  %s3131_s7 = sld [smem:[#allocation17_spill]] }
  0x7f   : > { %p1761_p13 = scmp.ne.s32.totalorder %s3131_s7, 0 }
  0x81   : > { %303 = sbr.rel (%p1761_p13) target bundleno = 151 (0x97), region = 56 }
  0x86   : > { %v2608_v0 = vmov 0.0  }
  0x87   : > { %304 = vst [vmem:[#allocation2 + $0xb0] sm:$0xff] %v2608_v0  ;;  %305 = vst [vmem:[#allocation2] sm:$0xff] %v2608_v0 }
  0x88   : > { %306 = vst [vmem:[#allocation2 + $0xd8] sm:$0xff] %v2608_v0  ;;  %307 = vst [vmem:[#allocation2 + $0x18] sm:$0xff] %v2608_v0 }
  0x89   : > { %308 = vst [vmem:[#allocation2 + $0x50] sm:$0xff] %v2608_v0  ;;  %309 = vst [vmem:[#allocation2 + $0x68] sm:$0xff] %v2608_v0 }
  0x8a   : > { %310 = vst [vmem:[#allocation2 + $0x30] sm:$0xff] %v2608_v0  ;;  %311 = vst [vmem:[#allocation2 + $0x48] sm:$0xff] %v2608_v0 }
  0x8b   : > { %312 = vst [vmem:[#allocation2 + $0x80] sm:$0xff] %v2608_v0  ;;  %313 = vst [vmem:[#allocation2 + $0x88] sm:$0xff] %v2608_v0 }
  0x8c   : > { %314 = vst [vmem:[#allocation2 + $0xe8] sm:$0xff] %v2608_v0  ;;  %315 = vst [vmem:[#allocation2 + $0xb8] sm:$0xff] %v2608_v0 }
  0x8d   : > { %316 = vst [vmem:[#allocation2 + $0x60] sm:$0xff] %v2608_v0  ;;  %317 = vst [vmem:[#allocation2 + $0xf0] sm:$0xff] %v2608_v0 }
  0x8e   : > { %318 = vst [vmem:[#allocation2 + $0x8] sm:$0xff] %v2608_v0  ;;  %319 = vst [vmem:[#allocation2 + $0x78] sm:$0xff] %v2608_v0 }
  0x8f   : > { %320 = vst [vmem:[#allocation2 + $0x38] sm:$0xff] %v2608_v0  ;;  %321 = vst [vmem:[#allocation2 + $0x58] sm:$0xff] %v2608_v0 }
  0x90   : > { %322 = vst [vmem:[#allocation2 + $0x40] sm:$0xff] %v2608_v0  ;;  %323 = vst [vmem:[#allocation2 + $0xc8] sm:$0xff] %v2608_v0 }
  0x91   : > { %324 = vst [vmem:[#allocation2 + $0xe0] sm:$0xff] %v2608_v0  ;;  %325 = vst [vmem:[#allocation2 + $0x90] sm:$0xff] %v2608_v0 }
  0x92   : > { %326 = vst [vmem:[#allocation2 + $0x70] sm:$0xff] %v2608_v0  ;;  %327 = vst [vmem:[#allocation2 + $0xc0] sm:$0xff] %v2608_v0 }
  0x93   : > { %328 = vst [vmem:[#allocation2 + $0xa8] sm:$0xff] %v2608_v0  ;;  %329 = vst [vmem:[#allocation2 + $0xd0] sm:$0xff] %v2608_v0 }
  0x94   : > { %330 = vst [vmem:[#allocation2 + $0x10] sm:$0xff] %v2608_v0  ;;  %331 = vst [vmem:[#allocation2 + $0x28] sm:$0xff] %v2608_v0 }
  0x95   : > { %332 = vst [vmem:[#allocation2 + $0xa0] sm:$0xff] %v2608_v0  ;;  %333 = vst [vmem:[#allocation2 + $0xf8] sm:$0xff] %v2608_v0 }
  0x96   : > { %334 = vst [vmem:[#allocation2 + $0x20] sm:$0xff] %v2608_v0  ;;  %335 = vst [vmem:[#allocation2 + $0x98] sm:$0xff] %v2608_v0 }
  0x97 PF: > { %s3132_s26 = sld [smem:[#allocation17_spill]]  ;;  %v2261_v1 = vld [vmem:[%s2832_s14 + $0x4] ss:$16 sps:$4 sm:$0xff]   ;;  %v2264_v2 = vld [vmem:[%s2832_s14 + $0xc] ss:$16 sps:$4 sm:$0xff]  }
  0x98   : > { %1045 = vmatprep.mubr.bf16.mxu0 %v2261_v1  ;;  %1206 = vmatprep.mubr.bf16.mxu1 %v2264_v2  ;;  %v2259_v33 = vld [vmem:[%s2832_s14] ss:$16 sps:$4 sm:$0xff]   ;;  %v2262_v36 = vld [vmem:[%s2832_s14 + $0x8] ss:$16 sps:$4 sm:$0xff]   ;;  %v2265_v37 = vld [vmem:[%s2832_s14 + $0x24] ss:$16 sps:$4 sm:$0xff]  }
  0x99   : > { %v2267_v38 = vld [vmem:[%s2832_s14 + $0x2c] ss:$16 sps:$4 sm:$0xff]   ;;  %v2269_v39 = vld [vmem:[%s2832_s14 + $0x20] ss:$16 sps:$4 sm:$0xff]   ;;  %v2270_v40 = vld [vmem:[%s2832_s14 + $0x28] ss:$16 sps:$4 sm:$0xff]  }
  0x9a   : > { %v2271_v41 = vld [vmem:[%s2832_s14 + $0x44] ss:$16 sps:$4 sm:$0xff]   ;;  %v2273_v42 = vld [vmem:[%s2832_s14 + $0x4c] ss:$16 sps:$4 sm:$0xff]   ;;  %v2275_v43 = vld [vmem:[%s2832_s14 + $0x40] ss:$16 sps:$4 sm:$0xff]  }
  0x9b   : > { %v2276_v44 = vld [vmem:[%s2832_s14 + $0x48] ss:$16 sps:$4 sm:$0xff]   ;;  %v2277_v45 = vld [vmem:[%s2832_s14 + $0x64] ss:$16 sps:$4 sm:$0xff]   ;;  %v2279_v46 = vld [vmem:[%s2832_s14 + $0x6c] ss:$16 sps:$4 sm:$0xff]  }
  0x9c   : > { %v2281_v47 = vld [vmem:[%s2832_s14 + $0x60] ss:$16 sps:$4 sm:$0xff]   ;;  %v2282_v48 = vld [vmem:[%s2832_s14 + $0x68] ss:$16 sps:$4 sm:$0xff]   ;;  %v2283_v49 = vld [vmem:[%s2832_s14 + $0x84] ss:$16 sps:$4 sm:$0xff]  }
  0x9d   : > { %s1762_s9 = sshll.u32 %s3132_s26, 9  ;;  %v2285_v50 = vld [vmem:[%s2832_s14 + $0x8c] ss:$16 sps:$4 sm:$0xff]   ;;  %v2287_v51 = vld [vmem:[%s2832_s14 + $0x80] ss:$16 sps:$4 sm:$0xff]   ;;  %p1860_p6 = scmp.ne.s32.totalorder %s3132_s26, 1 }
  0x9e   : > { %s433_s12 = sshra.s32 %s1762_s9, 3  ;;  %v2288_v52 = vld [vmem:[%s2832_s14 + $0x88] ss:$16 sps:$4 sm:$0xff]   ;;  %v2289_v53 = vld [vmem:[%s2832_s14 + $0xa4] ss:$16 sps:$4 sm:$0xff]  }
  0x9f   : > { %s1763_s13 = sshll.u32 %s433_s12, 2  ;;  %v2291_v54 = vld [vmem:[%s2832_s14 + $0xac] ss:$16 sps:$4 sm:$0xff]   ;;  %v2293_v55 = vld [vmem:[%s2832_s14 + $0xa0] ss:$16 sps:$4 sm:$0xff]  }
  0xa0   : > { %s2861_s10 = scalar_lea.vmem [#allocation6], %s1763_s13  ;;  %v2294_v56 = vld [vmem:[%s2832_s14 + $0xa8] ss:$16 sps:$4 sm:$0xff]   ;;  %v2295_v57 = vld [vmem:[%s2832_s14 + $0xc4] ss:$16 sps:$4 sm:$0xff]  }
  0xa1   : > { %v2227_v3 = vld [vmem:[%s2861_s10 + $0x78] sm:$0xff]   ;;  %v2231_v7 = vld [vmem:[%s2861_s10 + $0x70] sm:$0xff]   ;;  %v2235_v11 = vld [vmem:[%s2861_s10 + $0x68] sm:$0xff]  }
  0xa2   : > { %v2228_v4 = vld [vmem:[%s2861_s10 + $0xf8] sm:$0xff]   ;;  %1867 = vmatprep.subr.bf16.mxu0 %v2227_v3  ;;  %v2232_v8 = vld [vmem:[%s2861_s10 + $0xf0] sm:$0xff]   ;;  %v2236_v12 = vld [vmem:[%s2861_s10 + $0xe8] sm:$0xff]  }
  0xa3   : > { %v2229_v5 = vld [vmem:[%s2861_s10 + $0x38] sm:$0xff]   ;;  %1979 = vmatprep.subr.bf16.mxu1 %v2228_v4  ;;  %v2233_v9 = vld [vmem:[%s2861_s10 + $0x30] sm:$0xff]   ;;  %v2237_v13 = vld [vmem:[%s2861_s10 + $0x28] sm:$0xff]  }
  0xa4   : > { %v2230_v6 = vld [vmem:[%s2861_s10 + $0xb8] sm:$0xff]   ;;  %1868 = vmatpush3.bf16.msra.mxu0 %v2229_v5  ;;  %v2234_v10 = vld [vmem:[%s2861_s10 + $0xb0] sm:$0xff]   ;;  %v2238_v14 = vld [vmem:[%s2861_s10 + $0xa8] sm:$0xff]  }
  0xa5   : > { %1980 = vmatpush3.bf16.msra.mxu1 %v2230_v6  ;;  %1869 = vmatprep.subr.bf16.mxu0 %v2231_v7  ;;  %v2239_v15 = vld [vmem:[%s2861_s10 + $0x60] sm:$0xff]   ;;  %v2243_v19 = vld [vmem:[%s2861_s10 + $0x58] sm:$0xff]   ;;  %v2247_v23 = vld [vmem:[%s2861_s10 + $0x50] sm:$0xff]  }
  0xa6   : > { %1981 = vmatprep.subr.bf16.mxu1 %v2232_v8  ;;  %v2240_v16 = vld [vmem:[%s2861_s10 + $0xe0] sm:$0xff]   ;;  %v2244_v20 = vld [vmem:[%s2861_s10 + $0xd8] sm:$0xff]   ;;  %v2248_v24 = vld [vmem:[%s2861_s10 + $0xd0] sm:$0xff]  }
  0xa7   : > { %v2241_v17 = vld [vmem:[%s2861_s10 + $0x20] sm:$0xff]   ;;  %v2245_v21 = vld [vmem:[%s2861_s10 + $0x18] sm:$0xff]   ;;  %v2249_v25 = vld [vmem:[%s2861_s10 + $0x10] sm:$0xff]  }
  0xa8   : > { %1870 = vmatpush3.bf16.msra.mxu0 %v2233_v9  ;;  %v2242_v18 = vld [vmem:[%s2861_s10 + $0xa0] sm:$0xff]   ;;  %v2246_v22 = vld [vmem:[%s2861_s10 + $0x98] sm:$0xff]   ;;  %v2250_v26 = vld [vmem:[%s2861_s10 + $0x90] sm:$0xff]  }
  0xa9   : > { %1982 = vmatpush3.bf16.msra.mxu1 %v2234_v10  ;;  %1871 = vmatprep.subr.bf16.mxu0 %v2235_v11  ;;  %v2251_v27 = vld [vmem:[%s2861_s10 + $0x48] sm:$0xff]   ;;  %v2255_v31 = vld [vmem:[%s2861_s10 + $0x40] sm:$0xff]  }
  0xaa   : > { %1983 = vmatprep.subr.bf16.mxu1 %v2236_v12  ;;  %v2252_v28 = vld [vmem:[%s2861_s10 + $0xc8] sm:$0xff]   ;;  %v2256_v32 = vld [vmem:[%s2861_s10 + $0xc0] sm:$0xff]  }
  0xab   : > { %v2253_v29 = vld [vmem:[%s2861_s10 + $0x8] sm:$0xff]   ;;  %v2257_v34 = vld [vmem:[%s2861_s10] sm:$0xff]  }
  0xac   : > { %1872 = vmatpush3.bf16.msra.mxu0 %v2237_v13  ;;  %v2254_v30 = vld [vmem:[%s2861_s10 + $0x88] sm:$0xff]   ;;  %v2258_v35 = vld [vmem:[%s2861_s10 + $0x80] sm:$0xff]  }
  0xad   : > { %1984 = vmatpush3.bf16.msra.mxu1 %v2238_v14  ;;  %1873 = vmatprep.subr.bf16.mxu0 %v2239_v15  ;;  %v2297_v58 = vld [vmem:[%s2832_s14 + $0xcc] ss:$16 sps:$4 sm:$0xff]   ;;  %v2299_v59 = vld [vmem:[%s2832_s14 + $0xc0] ss:$16 sps:$4 sm:$0xff]   ;;  %v2300_v60 = vld [vmem:[%s2832_s14 + $0xc8] ss:$16 sps:$4 sm:$0xff]  }
  0xae   : > { %1985 = vmatprep.subr.bf16.mxu1 %v2240_v16  ;;  %v2301_v61 = vld [vmem:[%s2832_s14 + $0xe4] ss:$16 sps:$4 sm:$0xff]   ;;  %v2303_v62 = vld [vmem:[%s2832_s14 + $0xec] ss:$16 sps:$4 sm:$0xff]   ;;  %v2305_v63 = vld [vmem:[%s2832_s14 + $0xe0] ss:$16 sps:$4 sm:$0xff]  }
  0xaf   : > { %v2306_v0 = vld [vmem:[%s2832_s14 + $0xe8] ss:$16 sps:$4 sm:$0xff]   ;;  %v2307_v1 = vld [vmem:[%s2832_s14 + $0x104] ss:$16 sps:$4 sm:$0xff]   ;;  %v2309_v2 = vld [vmem:[%s2832_s14 + $0x10c] ss:$16 sps:$4 sm:$0xff]  }
  0xb0   : > { %1874 = vmatpush3.bf16.msra.mxu0 %v2241_v17  ;;  %v2311_v3 = vld [vmem:[%s2832_s14 + $0x100] ss:$16 sps:$4 sm:$0xff]   ;;  %v2312_v4 = vld [vmem:[%s2832_s14 + $0x108] ss:$16 sps:$4 sm:$0xff]   ;;  %v2313_v5 = vld [vmem:[%s2832_s14 + $0x124] ss:$16 sps:$4 sm:$0xff]  }
  0xb1   : > { %1986 = vmatpush3.bf16.msra.mxu1 %v2242_v18  ;;  %1875 = vmatprep.subr.bf16.mxu0 %v2243_v19  ;;  %v2315_v6 = vld [vmem:[%s2832_s14 + $0x12c] ss:$16 sps:$4 sm:$0xff]   ;;  %v2317_v7 = vld [vmem:[%s2832_s14 + $0x120] ss:$16 sps:$4 sm:$0xff]   ;;  %v2318_v8 = vld [vmem:[%s2832_s14 + $0x128] ss:$16 sps:$4 sm:$0xff]  }
  0xb2   : > { %1987 = vmatprep.subr.bf16.mxu1 %v2244_v20  ;;  %v2319_v9 = vld [vmem:[%s2832_s14 + $0x144] ss:$16 sps:$4 sm:$0xff]   ;;  %v2321_v10 = vld [vmem:[%s2832_s14 + $0x14c] ss:$16 sps:$4 sm:$0xff]   ;;  %v2323_v11 = vld [vmem:[%s2832_s14 + $0x140] ss:$16 sps:$4 sm:$0xff]  }
  0xb3   : > { %v2324_v12 = vld [vmem:[%s2832_s14 + $0x148] ss:$16 sps:$4 sm:$0xff]   ;;  %v2325_v13 = vld [vmem:[%s2832_s14 + $0x164] ss:$16 sps:$4 sm:$0xff]   ;;  %v2327_v14 = vld [vmem:[%s2832_s14 + $0x16c] ss:$16 sps:$4 sm:$0xff]  }
  0xb4   : > { %1876 = vmatpush3.bf16.msra.mxu0 %v2245_v21  ;;  %v2329_v15 = vld [vmem:[%s2832_s14 + $0x160] ss:$16 sps:$4 sm:$0xff]   ;;  %v2330_v16 = vld [vmem:[%s2832_s14 + $0x168] ss:$16 sps:$4 sm:$0xff]   ;;  %v2331_v17 = vld [vmem:[%s2832_s14 + $0x184] ss:$16 sps:$4 sm:$0xff]  }
  0xb5   : > { %1988 = vmatpush3.bf16.msra.mxu1 %v2246_v22  ;;  %1877 = vmatprep.subr.bf16.mxu0 %v2247_v23  ;;  %v2333_v18 = vld [vmem:[%s2832_s14 + $0x18c] ss:$16 sps:$4 sm:$0xff]   ;;  %v2335_v19 = vld [vmem:[%s2832_s14 + $0x180] ss:$16 sps:$4 sm:$0xff]   ;;  %v2336_v20 = vld [vmem:[%s2832_s14 + $0x188] ss:$16 sps:$4 sm:$0xff]  }
  0xb6   : > { %1989 = vmatprep.subr.bf16.mxu1 %v2248_v24  ;;  %v2337_v21 = vld [vmem:[%s2832_s14 + $0x1a4] ss:$16 sps:$4 sm:$0xff]   ;;  %v2339_v22 = vld [vmem:[%s2832_s14 + $0x1ac] ss:$16 sps:$4 sm:$0xff]   ;;  %v2341_v23 = vld [vmem:[%s2832_s14 + $0x1a0] ss:$16 sps:$4 sm:$0xff]  }
  0xb7   : > { %v2342_v24 = vld [vmem:[%s2832_s14 + $0x1a8] ss:$16 sps:$4 sm:$0xff]  }
  0xb8   : > { %1878 = vmatpush3.bf16.msra.mxu0 %v2249_v25  ;;  %v2343_v25 = vld [vmem:[%s2832_s14 + $0x1c4] ss:$16 sps:$4 sm:$0xff]  }
  0xb9   : > { %1990 = vmatpush3.bf16.msra.mxu1 %v2250_v26  ;;  %1879 = vmatprep.subr.bf16.mxu0 %v2251_v27  ;;  %v2345_v26 = vld [vmem:[%s2832_s14 + $0x1cc] ss:$16 sps:$4 sm:$0xff]   ;;  %v2347_v27 = vld [vmem:[%s2832_s14 + $0x1c0] ss:$16 sps:$4 sm:$0xff]  }
  0xba   : > { %1991 = vmatprep.subr.bf16.mxu1 %v2252_v28  ;;  %v2348_v28 = vld [vmem:[%s2832_s14 + $0x1c8] ss:$16 sps:$4 sm:$0xff]  }
  0xbc   : > { %1880 = vmatpush3.bf16.msra.mxu0 %v2253_v29  ;;  %v2349_v29 = vld [vmem:[%s2832_s14 + $0x1e4] ss:$16 sps:$4 sm:$0xff]  }
  0xbd   : > { %1992 = vmatpush3.bf16.msra.mxu1 %v2254_v30  ;;  %1881 = vmatprep.subr.bf16.mxu0 %v2255_v31  ;;  %v2351_v30 = vld [vmem:[%s2832_s14 + $0x1ec] ss:$16 sps:$4 sm:$0xff]   ;;  %v2353_v31 = vld [vmem:[%s2832_s14 + $0x1e0] ss:$16 sps:$4 sm:$0xff]  }
  0xbe   : > { %1993 = vmatprep.subr.bf16.mxu1 %v2256_v32  ;;  %v2354_v32 = vld [vmem:[%s2832_s14 + $0x1e8] ss:$16 sps:$4 sm:$0xff]  }
  0xc0   : > { %1882 = vmatpush3.bf16.msra.mxu0 %v2257_v34 }
  0xc1   : > { %1994 = vmatpush3.bf16.msra.mxu1 %v2258_v35 }
  0xc3   : > { %1046 = vmatmul.mubr.bf16.vlgmr.msra.gmra.mxu0 %v2259_v33 }
  0xc4   : > { %1207 = vmatmul.mubr.bf16.vlgmr.msra.gmra.mxu1 %v2262_v36  ;;  %1053 = vmatprep.mubr.bf16.mxu0 %v2265_v37 }
  0xc5   : > { %1214 = vmatprep.mubr.bf16.mxu1 %v2267_v38 }
  0xcb   : > { %1054 = vmatmul.mubr.bf16.gmra.mxu0 %v2269_v39 }
  0xcc   : > { %1215 = vmatmul.mubr.bf16.gmra.mxu1 %v2270_v40  ;;  %1061 = vmatprep.mubr.bf16.mxu0 %v2271_v41  ;;  %v337_v40 = vld [vmem:[#allocation2 + $0xb0] sm:$0xff] }
  0xcd   : > { %1222 = vmatprep.mubr.bf16.mxu1 %v2273_v42 }
  0xd3   : > { %1062 = vmatmul.mubr.bf16.gmra.mxu0 %v2275_v43 }
  0xd4   : > { %1223 = vmatmul.mubr.bf16.gmra.mxu1 %v2276_v44  ;;  %1069 = vmatprep.mubr.bf16.mxu0 %v2277_v45 }
  0xd5   : > { %1230 = vmatprep.mubr.bf16.mxu1 %v2279_v46 }
  0xdb   : > { %1070 = vmatmul.mubr.bf16.gmra.mxu0 %v2281_v47 }
  0xdc   : > { %1231 = vmatmul.mubr.bf16.gmra.mxu1 %v2282_v48  ;;  %1077 = vmatprep.mubr.bf16.mxu0 %v2283_v49  ;;  %v338_v49 = vld [vmem:[#allocation2] sm:$0xff] }
  0xdd   : > { %1238 = vmatprep.mubr.bf16.mxu1 %v2285_v50 }
  0xe3   : > { %1078 = vmatmul.mubr.bf16.gmra.mxu0 %v2287_v51 }
  0xe4   : > { %1239 = vmatmul.mubr.bf16.gmra.mxu1 %v2288_v52  ;;  %1085 = vmatprep.mubr.bf16.mxu0 %v2289_v53 }
  0xe5   : > { %1246 = vmatprep.mubr.bf16.mxu1 %v2291_v54 }
  0xeb   : > { %1086 = vmatmul.mubr.bf16.gmra.mxu0 %v2293_v55 }
  0xec   : > { %1247 = vmatmul.mubr.bf16.gmra.mxu1 %v2294_v56  ;;  %1093 = vmatprep.mubr.bf16.mxu0 %v2295_v57 }
  0xed   : > { %1254 = vmatprep.mubr.bf16.mxu1 %v2297_v58  ;;  %v339_v58 = vld [vmem:[#allocation2 + $0xd8] sm:$0xff] }
  0xf3   : > { %1094 = vmatmul.mubr.bf16.gmra.mxu0 %v2299_v59 }
  0xf4   : > { %1255 = vmatmul.mubr.bf16.gmra.mxu1 %v2300_v60  ;;  %1101 = vmatprep.mubr.bf16.mxu0 %v2301_v61 }
  0xf5   : > { %1262 = vmatprep.mubr.bf16.mxu1 %v2303_v62 }
  0xfb   : > { %1102 = vmatmul.mubr.bf16.gmra.mxu0 %v2305_v63 }
  0xfc   : > { %1263 = vmatmul.mubr.bf16.gmra.mxu1 %v2306_v0  ;;  %1109 = vmatprep.mubr.bf16.mxu0 %v2307_v1 }
  0xfd   : > { %1270 = vmatprep.mubr.bf16.mxu1 %v2309_v2 }
 0x103   : > { %1110 = vmatmul.mubr.bf16.gmra.mxu0 %v2311_v3  ;;  %v340_v3 = vld [vmem:[#allocation2 + $0x18] sm:$0xff] }
 0x104   : > { %1271 = vmatmul.mubr.bf16.gmra.mxu1 %v2312_v4  ;;  %1117 = vmatprep.mubr.bf16.mxu0 %v2313_v5 }
 0x105   : > { %1278 = vmatprep.mubr.bf16.mxu1 %v2315_v6 }
 0x10b   : > { %1118 = vmatmul.mubr.bf16.gmra.mxu0 %v2317_v7 }
 0x10c   : > { %1279 = vmatmul.mubr.bf16.gmra.mxu1 %v2318_v8  ;;  %1125 = vmatprep.mubr.bf16.mxu0 %v2319_v9 }
 0x10d   : > { %1286 = vmatprep.mubr.bf16.mxu1 %v2321_v10 }
 0x113   : > { %1126 = vmatmul.mubr.bf16.gmra.mxu0 %v2323_v11 }
 0x114   : > { %1287 = vmatmul.mubr.bf16.gmra.mxu1 %v2324_v12  ;;  %1133 = vmatprep.mubr.bf16.mxu0 %v2325_v13  ;;  %v341_v12 = vld [vmem:[#allocation2 + $0x50] sm:$0xff] }
 0x115   : > { %1294 = vmatprep.mubr.bf16.mxu1 %v2327_v14 }
 0x11b   : > { %1134 = vmatmul.mubr.bf16.gmra.mxu0 %v2329_v15 }
 0x11c   : > { %1295 = vmatmul.mubr.bf16.gmra.mxu1 %v2330_v16  ;;  %1141 = vmatprep.mubr.bf16.mxu0 %v2331_v17 }
 0x11d   : > { %1302 = vmatprep.mubr.bf16.mxu1 %v2333_v18 }
 0x123   : > { %1142 = vmatmul.mubr.bf16.gmra.mxu0 %v2335_v19 }
 0x124   : > { %1303 = vmatmul.mubr.bf16.gmra.mxu1 %v2336_v20  ;;  %1149 = vmatprep.mubr.bf16.mxu0 %v2337_v21  ;;  %v342_v21 = vld [vmem:[#allocation2 + $0x68] sm:$0xff] }
 0x125   : > { %1310 = vmatprep.mubr.bf16.mxu1 %v2339_v22 }
 0x12b   : > { %1150 = vmatmul.mubr.bf16.gmra.mxu0 %v2341_v23 }
 0x12c   : > { %1311 = vmatmul.mubr.bf16.gmra.mxu1 %v2342_v24  ;;  %1157 = vmatprep.mubr.bf16.mxu0 %v2343_v25 }
 0x12d   : > { %1318 = vmatprep.mubr.bf16.mxu1 %v2345_v26 }
 0x133   : > { %1158 = vmatmul.mubr.bf16.gmra.mxu0 %v2347_v27 }
 0x134   : > { %1319 = vmatmul.mubr.bf16.gmra.mxu1 %v2348_v28  ;;  %1165 = vmatprep.mubr.bf16.mxu0 %v2349_v29 }
 0x135   : > { %1326 = vmatprep.mubr.bf16.mxu1 %v2351_v30  ;;  %v343_v30 = vld [vmem:[#allocation2 + $0x30] sm:$0xff] }
 0x13b   : > { %1166 = vmatmul.mubr.bf16.gmra.mxu0 %v2353_v31 }
 0x13c   : > { %1327 = vmatmul.mubr.bf16.gmra.mxu1 %v2354_v32 }
 0x183   : > { %v1883_v33 = vpop.f32.mrf.mxu0 }
 0x184   : > { %v1995_v34 = vpop.f32.mrf.mxu1 }
 0x185   : > { %v1884_v35 = vpop.f32.mrf.mxu0 }
 0x186   : > { %v1885_v36 = vadd.f32 %v1884_v35, %v1883_v33  ;;  %v1996_v37 = vpop.f32.mrf.mxu1 }
 0x187   : > { %v1997_v38 = vadd.f32 %v1996_v37, %v1995_v34  ;;  %v1886_v39 = vpop.f32.mrf.mxu0 }
 0x188   : > { %v1998_v41 = vpop.f32.mrf.mxu1 }
 0x189   : > { %v1209_v42 = vadd.f32 %v1997_v38, %v1885_v36  ;;  %v1887_v43 = vpop.f32.mrf.mxu0 }
 0x18a   : > { %v1888_v44 = vadd.f32 %v1887_v43, %v1886_v39  ;;  %v1999_v45 = vpop.f32.mrf.mxu1  ;;  %v344_v39 = vld [vmem:[#allocation2 + $0x48] sm:$0xff] }
 0x18b   : > { %v1335_v46 = vadd.f32 %v1209_v42, %v337_v40  ;;  %v2000_v47 = vadd.f32 %v1999_v45, %v1998_v41  ;;  %v1889_v48 = vpop.f32.mrf.mxu0 }
 0x18c   : > { %v2001_v50 = vpop.f32.mrf.mxu1 }
 0x18d   : > { %1367 = vst [vmem:[#allocation2 + $0xb0] sm:$0xff] %v1335_v46  ;;  %v1212_v51 = vadd.f32 %v2000_v47, %v1888_v44  ;;  %v1890_v52 = vpop.f32.mrf.mxu0 }
 0x18e   : > { %v1891_v53 = vadd.f32 %v1890_v52, %v1889_v48  ;;  %v2002_v54 = vpop.f32.mrf.mxu1  ;;  %v345_v48 = vld [vmem:[#allocation2 + $0x80] sm:$0xff] }
 0x18f   : > { %v1336_v55 = vadd.f32 %v1212_v51, %v338_v49  ;;  %v2003_v56 = vadd.f32 %v2002_v54, %v2001_v50  ;;  %v1892_v57 = vpop.f32.mrf.mxu0 }
 0x190   : > { %v2004_v59 = vpop.f32.mrf.mxu1 }
 0x191   : > { %1368 = vst [vmem:[#allocation2] sm:$0xff] %v1336_v55  ;;  %v1217_v60 = vadd.f32 %v2003_v56, %v1891_v53  ;;  %v1893_v61 = vpop.f32.mrf.mxu0 }
 0x192   : > { %v1894_v62 = vadd.f32 %v1893_v61, %v1892_v57  ;;  %v2005_v63 = vpop.f32.mrf.mxu1  ;;  %v346_v57 = vld [vmem:[#allocation2 + $0x88] sm:$0xff] }
 0x193   : > { %v1337_v0 = vadd.f32 %v1217_v60, %v339_v58  ;;  %v2006_v1 = vadd.f32 %v2005_v63, %v2004_v59  ;;  %v1895_v2 = vpop.f32.mrf.mxu0 }
 0x194   : > { %v2007_v4 = vpop.f32.mrf.mxu1 }
 0x195   : > { %1369 = vst [vmem:[#allocation2 + $0xd8] sm:$0xff] %v1337_v0  ;;  %v1220_v5 = vadd.f32 %v2006_v1, %v1894_v62  ;;  %v1896_v6 = vpop.f32.mrf.mxu0 }
 0x196   : > { %v1897_v7 = vadd.f32 %v1896_v6, %v1895_v2  ;;  %v2008_v8 = vpop.f32.mrf.mxu1  ;;  %v347_v2 = vld [vmem:[#allocation2 + $0xe8] sm:$0xff] }
 0x197   : > { %v1338_v9 = vadd.f32 %v1220_v5, %v340_v3  ;;  %v2009_v10 = vadd.f32 %v2008_v8, %v2007_v4  ;;  %v1898_v11 = vpop.f32.mrf.mxu0 }
 0x198   : > { %v2010_v13 = vpop.f32.mrf.mxu1 }
 0x199   : > { %1370 = vst [vmem:[#allocation2 + $0x18] sm:$0xff] %v1338_v9  ;;  %v1225_v14 = vadd.f32 %v2009_v10, %v1897_v7  ;;  %v1899_v15 = vpop.f32.mrf.mxu0 }
 0x19a   : > { %v1900_v16 = vadd.f32 %v1899_v15, %v1898_v11  ;;  %v2011_v17 = vpop.f32.mrf.mxu1  ;;  %v348_v11 = vld [vmem:[#allocation2 + $0xb8] sm:$0xff] }
 0x19b   : > { %v1339_v18 = vadd.f32 %v1225_v14, %v341_v12  ;;  %v2012_v19 = vadd.f32 %v2011_v17, %v2010_v13  ;;  %v1901_v20 = vpop.f32.mrf.mxu0 }
 0x19c   : > { %v2013_v22 = vpop.f32.mrf.mxu1 }
 0x19d   : > { %1371 = vst [vmem:[#allocation2 + $0x50] sm:$0xff] %v1339_v18  ;;  %v1228_v23 = vadd.f32 %v2012_v19, %v1900_v16  ;;  %v1902_v24 = vpop.f32.mrf.mxu0 }
 0x19e   : > { %v1903_v25 = vadd.f32 %v1902_v24, %v1901_v20  ;;  %v2014_v26 = vpop.f32.mrf.mxu1  ;;  %v349_v20 = vld [vmem:[#allocation2 + $0x60] sm:$0xff] }
 0x19f   : > { %v1340_v27 = vadd.f32 %v1228_v23, %v342_v21  ;;  %v2015_v28 = vadd.f32 %v2014_v26, %v2013_v22  ;;  %v1904_v29 = vpop.f32.mrf.mxu0 }
 0x1a0   : > { %v2016_v31 = vpop.f32.mrf.mxu1 }
 0x1a1   : > { %1372 = vst [vmem:[#allocation2 + $0x68] sm:$0xff] %v1340_v27  ;;  %v1233_v32 = vadd.f32 %v2015_v28, %v1903_v25  ;;  %v1905_v33 = vpop.f32.mrf.mxu0 }
 0x1a2   : > { %v1906_v34 = vadd.f32 %v1905_v33, %v1904_v29  ;;  %v2017_v35 = vpop.f32.mrf.mxu1  ;;  %v350_v29 = vld [vmem:[#allocation2 + $0xf0] sm:$0xff] }
 0x1a3   : > { %v1341_v36 = vadd.f32 %v1233_v32, %v343_v30  ;;  %v2018_v37 = vadd.f32 %v2017_v35, %v2016_v31  ;;  %v1907_v38 = vpop.f32.mrf.mxu0 }
 0x1a4   : > { %v2019_v40 = vpop.f32.mrf.mxu1 }
 0x1a5   : > { %1373 = vst [vmem:[#allocation2 + $0x30] sm:$0xff] %v1341_v36  ;;  %v1236_v41 = vadd.f32 %v2018_v37, %v1906_v34  ;;  %v1908_v42 = vpop.f32.mrf.mxu0 }
 0x1a6   : > { %v1909_v43 = vadd.f32 %v1908_v42, %v1907_v38  ;;  %v2020_v44 = vpop.f32.mrf.mxu1  ;;  %v351_v38 = vld [vmem:[#allocation2 + $0x8] sm:$0xff] }
 0x1a7   : > { %v1342_v45 = vadd.f32 %v1236_v41, %v344_v39  ;;  %v2021_v46 = vadd.f32 %v2020_v44, %v2019_v40  ;;  %v1910_v47 = vpop.f32.mrf.mxu0 }
 0x1a8   : > { %v2022_v49 = vpop.f32.mrf.mxu1 }
 0x1a9   : > { %1374 = vst [vmem:[#allocation2 + $0x48] sm:$0xff] %v1342_v45  ;;  %v1241_v50 = vadd.f32 %v2021_v46, %v1909_v43  ;;  %v1911_v51 = vpop.f32.mrf.mxu0 }
 0x1aa   : > { %v1912_v52 = vadd.f32 %v1911_v51, %v1910_v47  ;;  %v2023_v53 = vpop.f32.mrf.mxu1  ;;  %v352_v47 = vld [vmem:[#allocation2 + $0x78] sm:$0xff] }
 0x1ab   : > { %v1343_v54 = vadd.f32 %v1241_v50, %v345_v48  ;;  %v2024_v55 = vadd.f32 %v2023_v53, %v2022_v49  ;;  %v1913_v56 = vpop.f32.mrf.mxu0 }
 0x1ac   : > { %v2025_v58 = vpop.f32.mrf.mxu1 }
 0x1ad   : > { %1375 = vst [vmem:[#allocation2 + $0x80] sm:$0xff] %v1343_v54  ;;  %v1244_v59 = vadd.f32 %v2024_v55, %v1912_v52  ;;  %v1914_v60 = vpop.f32.mrf.mxu0 }
 0x1ae   : > { %v1915_v61 = vadd.f32 %v1914_v60, %v1913_v56  ;;  %v2026_v62 = vpop.f32.mrf.mxu1  ;;  %v353_v56 = vld [vmem:[#allocation2 + $0x38] sm:$0xff] }
 0x1af   : > { %v1344_v63 = vadd.f32 %v1244_v59, %v346_v57  ;;  %v2027_v0 = vadd.f32 %v2026_v62, %v2025_v58  ;;  %v1916_v1 = vpop.f32.mrf.mxu0 }
 0x1b0   : > { %v2028_v3 = vpop.f32.mrf.mxu1 }
 0x1b1   : > { %1376 = vst [vmem:[#allocation2 + $0x88] sm:$0xff] %v1344_v63  ;;  %v1249_v4 = vadd.f32 %v2027_v0, %v1915_v61  ;;  %v1917_v5 = vpop.f32.mrf.mxu0 }
 0x1b2   : > { %v1918_v6 = vadd.f32 %v1917_v5, %v1916_v1  ;;  %v2029_v7 = vpop.f32.mrf.mxu1  ;;  %v354_v1 = vld [vmem:[#allocation2 + $0x58] sm:$0xff] }
 0x1b3   : > { %v1345_v8 = vadd.f32 %v1249_v4, %v347_v2  ;;  %v2030_v9 = vadd.f32 %v2029_v7, %v2028_v3  ;;  %v1919_v10 = vpop.f32.mrf.mxu0 }
 0x1b4   : > { %v2031_v12 = vpop.f32.mrf.mxu1 }
 0x1b5   : > { %1377 = vst [vmem:[#allocation2 + $0xe8] sm:$0xff] %v1345_v8  ;;  %v1252_v13 = vadd.f32 %v2030_v9, %v1918_v6  ;;  %v1920_v14 = vpop.f32.mrf.mxu0 }
 0x1b6   : > { %v1921_v15 = vadd.f32 %v1920_v14, %v1919_v10  ;;  %v2032_v16 = vpop.f32.mrf.mxu1  ;;  %v355_v10 = vld [vmem:[#allocation2 + $0x40] sm:$0xff] }
 0x1b7   : > { %v1346_v17 = vadd.f32 %v1252_v13, %v348_v11  ;;  %v2033_v18 = vadd.f32 %v2032_v16, %v2031_v12  ;;  %v1922_v19 = vpop.f32.mrf.mxu0 }
 0x1b8   : > { %v2034_v21 = vpop.f32.mrf.mxu1 }
 0x1b9   : > { %1378 = vst [vmem:[#allocation2 + $0xb8] sm:$0xff] %v1346_v17  ;;  %v1257_v22 = vadd.f32 %v2033_v18, %v1921_v15  ;;  %v1923_v23 = vpop.f32.mrf.mxu0 }
 0x1ba   : > { %v1924_v24 = vadd.f32 %v1923_v23, %v1922_v19  ;;  %v2035_v25 = vpop.f32.mrf.mxu1  ;;  %v356_v19 = vld [vmem:[#allocation2 + $0xc8] sm:$0xff] }
 0x1bb   : > { %v1347_v26 = vadd.f32 %v1257_v22, %v349_v20  ;;  %v2036_v27 = vadd.f32 %v2035_v25, %v2034_v21  ;;  %v1925_v28 = vpop.f32.mrf.mxu0 }
 0x1bc   : > { %v2037_v30 = vpop.f32.mrf.mxu1 }
 0x1bd   : > { %1379 = vst [vmem:[#allocation2 + $0x60] sm:$0xff] %v1347_v26  ;;  %v1260_v31 = vadd.f32 %v2036_v27, %v1924_v24  ;;  %v1926_v32 = vpop.f32.mrf.mxu0 }
 0x1be   : > { %v1927_v33 = vadd.f32 %v1926_v32, %v1925_v28  ;;  %v2038_v34 = vpop.f32.mrf.mxu1  ;;  %v357_v28 = vld [vmem:[#allocation2 + $0xe0] sm:$0xff] }
 0x1bf   : > { %v1348_v35 = vadd.f32 %v1260_v31, %v350_v29  ;;  %v2039_v36 = vadd.f32 %v2038_v34, %v2037_v30  ;;  %v1928_v37 = vpop.f32.mrf.mxu0 }
 0x1c0   : > { %v2040_v39 = vpop.f32.mrf.mxu1 }
 0x1c1   : > { %1380 = vst [vmem:[#allocation2 + $0xf0] sm:$0xff] %v1348_v35  ;;  %v1265_v40 = vadd.f32 %v2039_v36, %v1927_v33  ;;  %v1929_v41 = vpop.f32.mrf.mxu0 }
 0x1c2   : > { %v1930_v42 = vadd.f32 %v1929_v41, %v1928_v37  ;;  %v2041_v43 = vpop.f32.mrf.mxu1  ;;  %v358_v37 = vld [vmem:[#allocation2 + $0x90] sm:$0xff] }
 0x1c3   : > { %v1349_v44 = vadd.f32 %v1265_v40, %v351_v38  ;;  %v2042_v45 = vadd.f32 %v2041_v43, %v2040_v39  ;;  %v1931_v46 = vpop.f32.mrf.mxu0 }
 0x1c4   : > { %v2043_v48 = vpop.f32.mrf.mxu1 }
 0x1c5   : > { %1381 = vst [vmem:[#allocation2 + $0x8] sm:$0xff] %v1349_v44  ;;  %v1268_v49 = vadd.f32 %v2042_v45, %v1930_v42  ;;  %v1932_v50 = vpop.f32.mrf.mxu0 }
 0x1c6   : > { %v1933_v51 = vadd.f32 %v1932_v50, %v1931_v46  ;;  %v2044_v52 = vpop.f32.mrf.mxu1  ;;  %v359_v46 = vld [vmem:[#allocation2 + $0x70] sm:$0xff] }
 0x1c7   : > { %v1350_v53 = vadd.f32 %v1268_v49, %v352_v47  ;;  %v2045_v54 = vadd.f32 %v2044_v52, %v2043_v48  ;;  %v1934_v55 = vpop.f32.mrf.mxu0 }
 0x1c8   : > { %v2046_v57 = vpop.f32.mrf.mxu1 }
 0x1c9   : > { %1382 = vst [vmem:[#allocation2 + $0x78] sm:$0xff] %v1350_v53  ;;  %v1273_v58 = vadd.f32 %v2045_v54, %v1933_v51  ;;  %v1935_v59 = vpop.f32.mrf.mxu0 }
 0x1ca   : > { %v1936_v60 = vadd.f32 %v1935_v59, %v1934_v55  ;;  %v2047_v61 = vpop.f32.mrf.mxu1  ;;  %v360_v55 = vld [vmem:[#allocation2 + $0xc0] sm:$0xff] }
 0x1cb   : > { %v1351_v62 = vadd.f32 %v1273_v58, %v353_v56  ;;  %v2048_v63 = vadd.f32 %v2047_v61, %v2046_v57  ;;  %v1937_v0 = vpop.f32.mrf.mxu0 }
 0x1cc   : > { %v2049_v2 = vpop.f32.mrf.mxu1 }
 0x1cd   : > { %1383 = vst [vmem:[#allocation2 + $0x38] sm:$0xff] %v1351_v62  ;;  %v1276_v3 = vadd.f32 %v2048_v63, %v1936_v60  ;;  %v1938_v4 = vpop.f32.mrf.mxu0 }
 0x1ce   : > { %v1939_v5 = vadd.f32 %v1938_v4, %v1937_v0  ;;  %v2050_v6 = vpop.f32.mrf.mxu1  ;;  %v361_v0 = vld [vmem:[#allocation2 + $0xa8] sm:$0xff] }
 0x1cf   : > { %v1352_v7 = vadd.f32 %v1276_v3, %v354_v1  ;;  %v2051_v8 = vadd.f32 %v2050_v6, %v2049_v2  ;;  %v1940_v9 = vpop.f32.mrf.mxu0 }
 0x1d0   : > { %v2052_v11 = vpop.f32.mrf.mxu1 }
 0x1d1   : > { %1384 = vst [vmem:[#allocation2 + $0x58] sm:$0xff] %v1352_v7  ;;  %v1281_v12 = vadd.f32 %v2051_v8, %v1939_v5  ;;  %v1941_v13 = vpop.f32.mrf.mxu0 }
 0x1d2   : > { %v1942_v14 = vadd.f32 %v1941_v13, %v1940_v9  ;;  %v2053_v15 = vpop.f32.mrf.mxu1  ;;  %v362_v9 = vld [vmem:[#allocation2 + $0xd0] sm:$0xff] }
 0x1d3   : > { %v1353_v16 = vadd.f32 %v1281_v12, %v355_v10  ;;  %v2054_v17 = vadd.f32 %v2053_v15, %v2052_v11  ;;  %v1943_v18 = vpop.f32.mrf.mxu0 }
 0x1d4   : > { %v2055_v20 = vpop.f32.mrf.mxu1 }
 0x1d5   : > { %1385 = vst [vmem:[#allocation2 + $0x40] sm:$0xff] %v1353_v16  ;;  %v1284_v21 = vadd.f32 %v2054_v17, %v1942_v14  ;;  %v1944_v22 = vpop.f32.mrf.mxu0 }
 0x1d6   : > { %v1945_v23 = vadd.f32 %v1944_v22, %v1943_v18  ;;  %v2056_v24 = vpop.f32.mrf.mxu1  ;;  %v363_v18 = vld [vmem:[#allocation2 + $0x10] sm:$0xff] }
 0x1d7   : > { %v1354_v25 = vadd.f32 %v1284_v21, %v356_v19  ;;  %v2057_v26 = vadd.f32 %v2056_v24, %v2055_v20  ;;  %v1946_v27 = vpop.f32.mrf.mxu0 }
 0x1d8   : > { %v2058_v29 = vpop.f32.mrf.mxu1 }
 0x1d9   : > { %1386 = vst [vmem:[#allocation2 + $0xc8] sm:$0xff] %v1354_v25  ;;  %v1289_v30 = vadd.f32 %v2057_v26, %v1945_v23  ;;  %v1947_v31 = vpop.f32.mrf.mxu0 }
 0x1da   : > { %v1948_v32 = vadd.f32 %v1947_v31, %v1946_v27  ;;  %v2059_v33 = vpop.f32.mrf.mxu1  ;;  %v364_v27 = vld [vmem:[#allocation2 + $0x28] sm:$0xff] }
 0x1db   : > { %v1355_v34 = vadd.f32 %v1289_v30, %v357_v28  ;;  %v2060_v35 = vadd.f32 %v2059_v33, %v2058_v29  ;;  %v1949_v36 = vpop.f32.mrf.mxu0 }
 0x1dc   : > { %v2061_v38 = vpop.f32.mrf.mxu1 }
 0x1dd   : > { %1387 = vst [vmem:[#allocation2 + $0xe0] sm:$0xff] %v1355_v34  ;;  %v1292_v39 = vadd.f32 %v2060_v35, %v1948_v32  ;;  %v1950_v40 = vpop.f32.mrf.mxu0 }
 0x1de   : > { %v1951_v41 = vadd.f32 %v1950_v40, %v1949_v36  ;;  %v2062_v42 = vpop.f32.mrf.mxu1  ;;  %v365_v36 = vld [vmem:[#allocation2 + $0xa0] sm:$0xff] }
 0x1df   : > { %v1356_v43 = vadd.f32 %v1292_v39, %v358_v37  ;;  %v2063_v44 = vadd.f32 %v2062_v42, %v2061_v38  ;;  %v1952_v45 = vpop.f32.mrf.mxu0 }
 0x1e0   : > { %v2064_v47 = vpop.f32.mrf.mxu1 }
 0x1e1   : > { %1388 = vst [vmem:[#allocation2 + $0x90] sm:$0xff] %v1356_v43  ;;  %v1297_v48 = vadd.f32 %v2063_v44, %v1951_v41  ;;  %v1953_v49 = vpop.f32.mrf.mxu0 }
 0x1e2   : > { %v1954_v50 = vadd.f32 %v1953_v49, %v1952_v45  ;;  %v2065_v51 = vpop.f32.mrf.mxu1  ;;  %v366_v45 = vld [vmem:[#allocation2 + $0xf8] sm:$0xff] }
 0x1e3   : > { %v1357_v52 = vadd.f32 %v1297_v48, %v359_v46  ;;  %v2066_v53 = vadd.f32 %v2065_v51, %v2064_v47  ;;  %v1955_v54 = vpop.f32.mrf.mxu0 }
 0x1e4   : > { %v2067_v56 = vpop.f32.mrf.mxu1 }
 0x1e5   : > { %1389 = vst [vmem:[#allocation2 + $0x70] sm:$0xff] %v1357_v52  ;;  %v1300_v57 = vadd.f32 %v2066_v53, %v1954_v50  ;;  %v1956_v58 = vpop.f32.mrf.mxu0 }
 0x1e6   : > { %v1957_v59 = vadd.f32 %v1956_v58, %v1955_v54  ;;  %v2068_v60 = vpop.f32.mrf.mxu1  ;;  %v367_v54 = vld [vmem:[#allocation2 + $0x20] sm:$0xff] }
 0x1e7   : > { %v1358_v61 = vadd.f32 %v1300_v57, %v360_v55  ;;  %v2069_v62 = vadd.f32 %v2068_v60, %v2067_v56  ;;  %v1958_v63 = vpop.f32.mrf.mxu0 }
 0x1e8   : > { %v2070_v1 = vpop.f32.mrf.mxu1 }
 0x1e9   : > { %1390 = vst [vmem:[#allocation2 + $0xc0] sm:$0xff] %v1358_v61  ;;  %v1305_v2 = vadd.f32 %v2069_v62, %v1957_v59  ;;  %v1959_v3 = vpop.f32.mrf.mxu0  ;;  %v368_v62 = vld [vmem:[#allocation2 + $0x98] sm:$0xff] }
 0x1ea   : > { %v1960_v4 = vadd.f32 %v1959_v3, %v1958_v63  ;;  %v2071_v5 = vpop.f32.mrf.mxu1 }
 0x1eb   : > { %v1359_v6 = vadd.f32 %v1305_v2, %v361_v0  ;;  %v2072_v7 = vadd.f32 %v2071_v5, %v2070_v1  ;;  %v1961_v8 = vpop.f32.mrf.mxu0 }
 0x1ec   : > { %v2073_v10 = vpop.f32.mrf.mxu1 }
 0x1ed   : > { %1391 = vst [vmem:[#allocation2 + $0xa8] sm:$0xff] %v1359_v6  ;;  %v1308_v11 = vadd.f32 %v2072_v7, %v1960_v4  ;;  %v1962_v12 = vpop.f32.mrf.mxu0 }
 0x1ee   : > { %v1963_v13 = vadd.f32 %v1962_v12, %v1961_v8  ;;  %v2074_v14 = vpop.f32.mrf.mxu1 }
 0x1ef   : > { %v1360_v15 = vadd.f32 %v1308_v11, %v362_v9  ;;  %v2075_v16 = vadd.f32 %v2074_v14, %v2073_v10  ;;  %v1964_v17 = vpop.f32.mrf.mxu0 }
 0x1f0   : > { %v2076_v19 = vpop.f32.mrf.mxu1 }
 0x1f1   : > { %1392 = vst [vmem:[#allocation2 + $0xd0] sm:$0xff] %v1360_v15  ;;  %v1313_v20 = vadd.f32 %v2075_v16, %v1963_v13  ;;  %v1965_v21 = vpop.f32.mrf.mxu0 }
 0x1f2   : > { %v1966_v22 = vadd.f32 %v1965_v21, %v1964_v17  ;;  %v2077_v23 = vpop.f32.mrf.mxu1 }
 0x1f3   : > { %v1361_v24 = vadd.f32 %v1313_v20, %v363_v18  ;;  %v2078_v25 = vadd.f32 %v2077_v23, %v2076_v19  ;;  %v1967_v26 = vpop.f32.mrf.mxu0 }
 0x1f4   : > { %v2079_v28 = vpop.f32.mrf.mxu1 }
 0x1f5   : > { %1393 = vst [vmem:[#allocation2 + $0x10] sm:$0xff] %v1361_v24  ;;  %v1316_v29 = vadd.f32 %v2078_v25, %v1966_v22  ;;  %v1968_v30 = vpop.f32.mrf.mxu0 }
 0x1f6   : > { %v1969_v31 = vadd.f32 %v1968_v30, %v1967_v26  ;;  %v2080_v32 = vpop.f32.mrf.mxu1 }
 0x1f7   : > { %v1362_v33 = vadd.f32 %v1316_v29, %v364_v27  ;;  %v2081_v34 = vadd.f32 %v2080_v32, %v2079_v28  ;;  %v1970_v35 = vpop.f32.mrf.mxu0 }
 0x1f8   : > { %v2082_v37 = vpop.f32.mrf.mxu1 }
 0x1f9   : > { %1394 = vst [vmem:[#allocation2 + $0x28] sm:$0xff] %v1362_v33  ;;  %v1321_v38 = vadd.f32 %v2081_v34, %v1969_v31  ;;  %v1971_v39 = vpop.f32.mrf.mxu0 }
 0x1fa   : > { %v1972_v40 = vadd.f32 %v1971_v39, %v1970_v35  ;;  %v2083_v41 = vpop.f32.mrf.mxu1 }
 0x1fb   : > { %v1363_v42 = vadd.f32 %v1321_v38, %v365_v36  ;;  %v2084_v43 = vadd.f32 %v2083_v41, %v2082_v37  ;;  %v1973_v44 = vpop.f32.mrf.mxu0 }
 0x1fc   : > { %v2085_v46 = vpop.f32.mrf.mxu1 }
 0x1fd   : > { %1395 = vst [vmem:[#allocation2 + $0xa0] sm:$0xff] %v1363_v42  ;;  %v1324_v47 = vadd.f32 %v2084_v43, %v1972_v40  ;;  %v1974_v48 = vpop.f32.mrf.mxu0 }
 0x1fe   : > { %v1975_v49 = vadd.f32 %v1974_v48, %v1973_v44  ;;  %v2086_v50 = vpop.f32.mrf.mxu1 }
 0x1ff   : > { %v1364_v51 = vadd.f32 %v1324_v47, %v366_v45  ;;  %v2087_v52 = vadd.f32 %v2086_v50, %v2085_v46  ;;  %v1976_v53 = vpop.f32.mrf.mxu0 }
 0x200   : > { %v2088_v55 = vpop.f32.mrf.mxu1 }
 0x201   : > { %1396 = vst [vmem:[#allocation2 + $0xf8] sm:$0xff] %v1364_v51  ;;  %v1329_v56 = vadd.f32 %v2087_v52, %v1975_v49  ;;  %v1977_v57 = vpop.f32.mrf.mxu0 }
 0x202   : > { %v1978_v58 = vadd.f32 %v1977_v57, %v1976_v53  ;;  %v2089_v59 = vpop.f32.mrf.mxu1 }
 0x203   : > { %v1365_v60 = vadd.f32 %v1329_v56, %v367_v54  ;;  %v2090_v61 = vadd.f32 %v2089_v59, %v2088_v55 }
 0x205   : > { %1397 = vst [vmem:[#allocation2 + $0x20] sm:$0xff] %v1365_v60  ;;  %v1332_v63 = vadd.f32 %v2090_v61, %v1978_v58  ;;  %1402 = sbr.rel (%p1860_p6) target bundleno = 605 (0x25d), region = 60 }
 0x207   : > { %v1366_v0 = vadd.f32 %v1332_v63, %v368_v62 }
 0x209   : > { %1398 = vst [vmem:[#allocation2 + $0x98] sm:$0xff] %v1366_v0 }
 0x20a   : > { %v1403_v1 = vld [vmem:[#allocation2 + $0xb0] sm:$0xff]  ;;  %v1404_v2 = vld [vmem:[#allocation2] sm:$0xff]  ;;  %v1405_v4 = vld [vmem:[#allocation2 + $0xd8] sm:$0xff] }
 0x20b   : > { %v2958_v3 = vld [vmem:[#allocation9] ss:$0 sm:$0xff]  ;;  %v1406_v7 = vld [vmem:[#allocation2 + $0x18] sm:$0xff]  ;;  %v1407_v9 = vld [vmem:[#allocation2 + $0x50] sm:$0xff] }
 0x20c   : > { %v1442_v5 = vadd.f32 %v2958_v3, %v1403_v1  ;;  %v1443_v6 = vadd.f32 %v2958_v3, %v1404_v2  ;;  %v1444_v8 = vadd.f32 %v2958_v3, %v1405_v4  ;;  %v1445_v10 = vadd.f32 %v2958_v3, %v1406_v7  ;;  %v1408_v13 = vld [vmem:[#allocation2 + $0x68] sm:$0xff]  ;;  %v1506_v14 = vld [vmem:[%s2846_s27] sm:$0xff]  ;;  %v1409_v18 = vld [vmem:[#allocation2 + $0x30] sm:$0xff] }
 0x20d   : > { %v1507_v15 = vld [vmem:[%s2846_s27 + $0x8] sm:$0xff]  ;;  %v1446_v16 = vadd.f32 %v2958_v3, %v1407_v9  ;;  %v1508_v19 = vld [vmem:[%s2846_s27 + $0x10] sm:$0xff]  ;;  %v1447_v20 = vadd.f32 %v2958_v3, %v1408_v13  ;;  %v1509_v25 = vld [vmem:[%s2846_s27 + $0x18] sm:$0xff]  ;;  %v1448_v26 = vadd.f32 %v2958_v3, %v1409_v18 }
 0x20e   : > { %v1474_v11 = vmax.f32 %v1442_v5, 0.0  ;;  %v1475_v12 = vmax.f32 %v1443_v6, 0.0  ;;  %v1476_v17 = vmax.f32 %v1444_v8, 0.0  ;;  %v1477_v21 = vmax.f32 %v1445_v10, 0.0  ;;  %v1410_v24 = vld [vmem:[#allocation2 + $0x48] sm:$0xff]  ;;  %v1411_v29 = vld [vmem:[#allocation2 + $0x80] sm:$0xff] }
 0x20f   : > { %v1478_v27 = vmax.f32 %v1446_v16, 0.0  ;;  %v1510_v30 = vld [vmem:[%s2846_s27 + $0x20] sm:$0xff]  ;;  %v1449_v31 = vadd.f32 %v2958_v3, %v1410_v24  ;;  %v1479_v32 = vmax.f32 %v1447_v20, 0.0  ;;  %v1412_v35 = vld [vmem:[#allocation2 + $0x88] sm:$0xff]  ;;  %v1450_v37 = vadd.f32 %v2958_v3, %v1411_v29  ;;  %v1512_v42 = vld [vmem:[%s2846_s27 + $0x30] sm:$0xff] }
 0x210   : > { %v1538_v22 = vadd.f32 %v1506_v14, %v1474_v11  ;;  %v1539_v23 = vadd.f32 %v1507_v15, %v1475_v12  ;;  %v1540_v28 = vadd.f32 %v1508_v19, %v1476_v17  ;;  %v1541_v33 = vadd.f32 %v1509_v25, %v1477_v21  ;;  %v1511_v36 = vld [vmem:[%s2846_s27 + $0x28] sm:$0xff]  ;;  %v1414_v47 = vld [vmem:[#allocation2 + $0xb8] sm:$0xff]  ;;  %v1415_v53 = vld [vmem:[#allocation2 + $0x60] sm:$0xff] }
 0x211   : > { %v1480_v38 = vmax.f32 %v1448_v26, 0.0  ;;  %v1542_v39 = vadd.f32 %v1510_v30, %v1478_v27  ;;  %v1413_v41 = vld [vmem:[#allocation2 + $0xe8] sm:$0xff]  ;;  %v1451_v43 = vadd.f32 %v2958_v3, %v1412_v35  ;;  %v1481_v44 = vmax.f32 %v1449_v31, 0.0  ;;  %v1513_v48 = vld [vmem:[%s2846_s27 + $0x38] sm:$0xff]  ;;  %v1514_v54 = vld [vmem:[%s2846_s27 + $0x40] sm:$0xff] }
 0x212   : > { %v1570_v34 = vadd.f32 %v1539_v23, %v1538_v22  ;;  %v1543_v45 = vadd.f32 %v1511_v36, %v1479_v32  ;;  %v1452_v49 = vadd.f32 %v2958_v3, %v1413_v41  ;;  %v1482_v50 = vmax.f32 %v1450_v37, 0.0  ;;  %v1416_v59 = vld [vmem:[#allocation2 + $0xf0] sm:$0xff]  ;;  %v1515_v60 = vld [vmem:[%s2846_s27 + $0x48] sm:$0xff]  ;;  %v1418_v8 = vld [vmem:[#allocation2 + $0x78] sm:$0xff] }
 0x213   : > { %v1544_v51 = vadd.f32 %v1512_v42, %v1480_v38  ;;  %v1453_v55 = vadd.f32 %v2958_v3, %v1414_v47  ;;  %v1483_v56 = vmax.f32 %v1451_v43, 0.0  ;;  %v1545_v57 = vadd.f32 %v1513_v48, %v1481_v44  ;;  %v1417_v1 = vld [vmem:[#allocation2 + $0x8] sm:$0xff]  ;;  %v1516_v2 = vld [vmem:[%s2846_s27 + $0x50] sm:$0xff]  ;;  %v1517_v9 = vld [vmem:[%s2846_s27 + $0x58] sm:$0xff] }
 0x214   : > { %v1571_v40 = vadd.f32 %v1570_v34, %v1540_v28  ;;  %v1454_v61 = vadd.f32 %v2958_v3, %v1415_v53  ;;  %v1484_v62 = vmax.f32 %v1452_v49, 0.0  ;;  %v1546_v63 = vadd.f32 %v1514_v54, %v1482_v50  ;;  %v1419_v14 = vld [vmem:[#allocation2 + $0x38] sm:$0xff]  ;;  %v1518_v15 = vld [vmem:[%s2846_s27 + $0x60] sm:$0xff]  ;;  %v1519_v21 = vld [vmem:[%s2846_s27 + $0x68] sm:$0xff] }
 0x215   : > { %v1455_v4 = vadd.f32 %v2958_v3, %v1416_v59  ;;  %v1485_v5 = vmax.f32 %v1453_v55, 0.0  ;;  %v1547_v6 = vadd.f32 %v1515_v60, %v1483_v56  ;;  %v1456_v10 = vadd.f32 %v2958_v3, %v1417_v1  ;;  %v1420_v20 = vld [vmem:[#allocation2 + $0x58] sm:$0xff]  ;;  %v1421_v26 = vld [vmem:[#allocation2 + $0x40] sm:$0xff]  ;;  %v1520_v27 = vld [vmem:[%s2846_s27 + $0x70] sm:$0xff] }
 0x216   : > { %v1572_v46 = vadd.f32 %v1571_v40, %v1541_v33  ;;  %v1486_v11 = vmax.f32 %v1454_v61, 0.0  ;;  %v1548_v12 = vadd.f32 %v1516_v2, %v1484_v62  ;;  %v1457_v16 = vadd.f32 %v2958_v3, %v1418_v8  ;;  %v1422_v32 = vld [vmem:[#allocation2 + $0xc8] sm:$0xff]  ;;  %v1521_v33 = vld [vmem:[%s2846_s27 + $0x78] sm:$0xff]  ;;  %v1423_v38 = vld [vmem:[#allocation2 + $0xe0] sm:$0xff] }
 0x217   : > { %v1487_v17 = vmax.f32 %v1455_v4, 0.0  ;;  %v1549_v18 = vadd.f32 %v1517_v9, %v1485_v5  ;;  %v1458_v22 = vadd.f32 %v2958_v3, %v1419_v14  ;;  %v1488_v23 = vmax.f32 %v1456_v10, 0.0  ;;  %v1424_v44 = vld [vmem:[#allocation2 + $0x90] sm:$0xff]  ;;  %v1426_v56 = vld [vmem:[#allocation2 + $0xc0] sm:$0xff]  ;;  %v1427_v62 = vld [vmem:[#allocation2 + $0xa8] sm:$0xff] }
 0x218   : > { %v1573_v52 = vadd.f32 %v1572_v46, %v1542_v39  ;;  %v1550_v24 = vadd.f32 %v1518_v15, %v1486_v11  ;;  %v1459_v28 = vadd.f32 %v2958_v3, %v1420_v20  ;;  %v1489_v29 = vmax.f32 %v1457_v16, 0.0  ;;  %v1522_v39 = vld [vmem:[%s2846_s27 + $0x80] sm:$0xff]  ;;  %v1425_v50 = vld [vmem:[#allocation2 + $0x70] sm:$0xff] }
 0x219   : > { %v1551_v30 = vadd.f32 %v1519_v21, %v1487_v17  ;;  %v1460_v34 = vadd.f32 %v2958_v3, %v1421_v26  ;;  %v1490_v35 = vmax.f32 %v1458_v22, 0.0  ;;  %v1552_v36 = vadd.f32 %v1520_v27, %v1488_v23  ;;  %v1428_v5 = vld [vmem:[#allocation2 + $0xd0] sm:$0xff]  ;;  %v1430_v17 = vld [vmem:[#allocation2 + $0x28] sm:$0xff]  ;;  %v1431_v23 = vld [vmem:[#allocation2 + $0xa0] sm:$0xff] }
 0x21a   : > { %v1574_v58 = vadd.f32 %v1573_v52, %v1543_v45  ;;  %v1461_v40 = vadd.f32 %v2958_v3, %v1422_v32  ;;  %v1491_v41 = vmax.f32 %v1459_v28, 0.0  ;;  %v1553_v42 = vadd.f32 %v1521_v33, %v1489_v29  ;;  %v1523_v45 = vld [vmem:[%s2846_s27 + $0x88] sm:$0xff]  ;;  %v1429_v11 = vld [vmem:[#allocation2 + $0x10] sm:$0xff]  ;;  %v1432_v29 = vld [vmem:[#allocation2 + $0xf8] sm:$0xff] }
 0x21b   : > { %v1462_v46 = vadd.f32 %v2958_v3, %v1423_v38  ;;  %v1492_v47 = vmax.f32 %v1460_v34, 0.0  ;;  %v1554_v48 = vadd.f32 %v1522_v39, %v1490_v35  ;;  %v1463_v52 = vadd.f32 %v2958_v3, %v1424_v44  ;;  %v1433_v35 = vld [vmem:[#allocation2 + $0x20] sm:$0xff] }
 0x21c   : > { %v1575_v0 = vadd.f32 %v1574_v58, %v1544_v51  ;;  %v1524_v51 = vld [vmem:[%s2846_s27 + $0x90] sm:$0xff]  ;;  %v1493_v53 = vmax.f32 %v1461_v40, 0.0  ;;  %v1555_v54 = vadd.f32 %v1523_v45, %v1491_v41  ;;  %v1464_v58 = vadd.f32 %v2958_v3, %v1425_v50  ;;  %v1434_v41 = vld [vmem:[#allocation2 + $0x98] sm:$0xff] }
 0x21d   : > { %v1494_v59 = vmax.f32 %v1462_v46, 0.0  ;;  %v1556_v60 = vadd.f32 %v1524_v51, %v1492_v47  ;;  %v1495_v1 = vmax.f32 %v1463_v52, 0.0  ;;  %v1534_v47 = vld [vmem:[%s2846_s27 + $0xe0] sm:$0xff]  ;;  %v1535_v52 = vld [vmem:[%s2846_s27 + $0xe8] sm:$0xff] }
 0x21e   : > { %v1576_v7 = vadd.f32 %v1575_v0, %v1545_v57  ;;  %v1525_v57 = vld [vmem:[%s2846_s27 + $0x98] sm:$0xff]  ;;  %v1465_v0 = vadd.f32 %v2958_v3, %v1426_v56  ;;  %v1496_v8 = vmax.f32 %v1464_v58, 0.0  ;;  %v1536_v56 = vld [vmem:[%s2846_s27 + $0xf0] sm:$0xff] }
 0x21f   : > { %v1557_v2 = vadd.f32 %v1525_v57, %v1493_v53 }
 0x220   : > { %v1577_v13 = vadd.f32 %v1576_v7, %v1546_v63  ;;  %v1526_v63 = vld [vmem:[%s2846_s27 + $0xa0] sm:$0xff]  ;;  %v1466_v7 = vadd.f32 %v2958_v3, %v1427_v62  ;;  %v1497_v14 = vmax.f32 %v1465_v0, 0.0 }
 0x221   : > { %v1558_v9 = vadd.f32 %v1526_v63, %v1494_v59 }
 0x222   : > { %v1578_v19 = vadd.f32 %v1577_v13, %v1547_v6  ;;  %v1527_v6 = vld [vmem:[%s2846_s27 + $0xa8] sm:$0xff]  ;;  %v1467_v13 = vadd.f32 %v2958_v3, %v1428_v5  ;;  %v1498_v20 = vmax.f32 %v1466_v7, 0.0 }
 0x223   : > { %v1559_v15 = vadd.f32 %v1527_v6, %v1495_v1 }
 0x224   : > { %v1579_v25 = vadd.f32 %v1578_v19, %v1548_v12  ;;  %v1528_v12 = vld [vmem:[%s2846_s27 + $0xb0] sm:$0xff]  ;;  %v1468_v19 = vadd.f32 %v2958_v3, %v1429_v11  ;;  %v1499_v26 = vmax.f32 %v1467_v13, 0.0 }
 0x225   : > { %v1560_v21 = vadd.f32 %v1528_v12, %v1496_v8 }
 0x226   : > { %v1580_v31 = vadd.f32 %v1579_v25, %v1549_v18  ;;  %v1529_v18 = vld [vmem:[%s2846_s27 + $0xb8] sm:$0xff]  ;;  %v1469_v25 = vadd.f32 %v2958_v3, %v1430_v17  ;;  %v1500_v32 = vmax.f32 %v1468_v19, 0.0 }
 0x227   : > { %v1561_v27 = vadd.f32 %v1529_v18, %v1497_v14 }
 0x228   : > { %v1581_v37 = vadd.f32 %v1580_v31, %v1550_v24  ;;  %v1530_v24 = vld [vmem:[%s2846_s27 + $0xc0] sm:$0xff]  ;;  %v1470_v31 = vadd.f32 %v2958_v3, %v1431_v23  ;;  %v1501_v38 = vmax.f32 %v1469_v25, 0.0 }
 0x229   : > { %v1562_v33 = vadd.f32 %v1530_v24, %v1498_v20 }
 0x22a   : > { %v1582_v43 = vadd.f32 %v1581_v37, %v1551_v30  ;;  %v1531_v30 = vld [vmem:[%s2846_s27 + $0xc8] sm:$0xff]  ;;  %v1471_v37 = vadd.f32 %v2958_v3, %v1432_v29  ;;  %v1502_v44 = vmax.f32 %v1470_v31, 0.0 }
 0x22b   : > { %v1563_v39 = vadd.f32 %v1531_v30, %v1499_v26 }
 0x22c   : > { %v1583_v49 = vadd.f32 %v1582_v43, %v1552_v36  ;;  %v1532_v36 = vld [vmem:[%s2846_s27 + $0xd0] sm:$0xff]  ;;  %v1472_v43 = vadd.f32 %v2958_v3, %v1433_v35 }
 0x22d   : > { %v1564_v45 = vadd.f32 %v1532_v36, %v1500_v32 }
 0x22e   : > { %v1584_v55 = vadd.f32 %v1583_v49, %v1553_v42  ;;  %v1533_v42 = vld [vmem:[%s2846_s27 + $0xd8] sm:$0xff]  ;;  %v1503_v49 = vmax.f32 %v1471_v37, 0.0  ;;  %v1504_v53 = vmax.f32 %v1472_v43, 0.0 }
 0x22f   : > { %v1565_v50 = vadd.f32 %v1533_v42, %v1501_v38 }
 0x230   : > { %v1585_v61 = vadd.f32 %v1584_v55, %v1554_v48  ;;  %v1473_v48 = vadd.f32 %v2958_v3, %v1434_v41  ;;  %v1567_v58 = vadd.f32 %v1535_v52, %v1503_v49 }
 0x232   : > { %v1586_v4 = vadd.f32 %v1585_v61, %v1555_v54  ;;  %v1566_v54 = vadd.f32 %v1534_v47, %v1502_v44  ;;  %v1505_v57 = vmax.f32 %v1473_v48, 0.0  ;;  %v1568_v61 = vadd.f32 %v1536_v56, %v1504_v53 }
 0x234   : > { %v1587_v10 = vadd.f32 %v1586_v4, %v1556_v60  ;;  %v1537_v60 = vld [vmem:[%s2846_s27 + $0xf8] sm:$0xff] }
 0x235   : > { %v1569_v63 = vadd.f32 %v1537_v60, %v1505_v57 }
 0x236   : > { %v1588_v16 = vadd.f32 %v1587_v10, %v1557_v2 }
 0x238   : > { %v1589_v22 = vadd.f32 %v1588_v16, %v1558_v9 }
 0x23a   : > { %v1590_v28 = vadd.f32 %v1589_v22, %v1559_v15 }
 0x23c   : > { %v1591_v34 = vadd.f32 %v1590_v28, %v1560_v21 }
 0x23e   : > { %v1592_v40 = vadd.f32 %v1591_v34, %v1561_v27 }
 0x240   : > { %v1593_v46 = vadd.f32 %v1592_v40, %v1562_v33 }
 0x242   : > { %v1594_v51 = vadd.f32 %v1593_v46, %v1563_v39 }
 0x244   : > { %v1595_v55 = vadd.f32 %v1594_v51, %v1564_v45 }
 0x246   : > { %v1596_v59 = vadd.f32 %v1595_v55, %v1565_v50 }
 0x248   : > { %v1597_v62 = vadd.f32 %v1596_v59, %v1566_v54 }
 0x24a   : > { %v1598_v0 = vadd.f32 %v1597_v62, %v1567_v58 }
 0x24c   : > { %v1599_v1 = vadd.f32 %v1598_v0, %v1568_v61 }
 0x24e   : > { %v1600_v2 = vadd.f32 %v1599_v1, %v1569_v63 }
 0x250   : > { %v1601_v3 = vrot.slane %v1600_v2, 4 }
 0x252   : > { %v1602_v4 = vadd.f32 %v1601_v3, %v1600_v2 }
 0x254   : > { %v1603_v5 = vrot.slane %v1602_v4, 2 }
 0x256   : > { %v1604_v6 = vadd.f32 %v1603_v5, %v1602_v4 }
 0x258   : > { %v1605_v7 = vrot.slane %v1604_v6, 1 }
 0x25a   : > { %v1606_v8 = vadd.f32 %v1605_v7, %v1604_v6 }
 0x25c   : > { %1607 = vst [vmem:[%s295_s11] sm:$0x1] %v1606_v8 }
 0x25d PF: > { %s3133_s22 = sld [smem:[#allocation18_spill]]  ;;  %s1621_s14 = sshll.u32 %s295_s11, 4  ;;  %s1622_s14 = int_to_ptr.vmem [resolvable:$true] %s1621_s14 }
 0x25e   : > { %s3134_s28 = sld [smem:[#allocation25_spill]]  ;;  %s1609_s5 = scalar_lea.sflag [#allocation5], %s2843_s6 }
 0x25f   : > { %s2463_s29 = scalar_lea.vmem %s1622_s14, 16  ;;  %p3135_p7 = scmp.ne.s32.totalorder %s3123_s15, 0 }
 0x260   : > { %p2464_p12 = scmp.ne.s32.totalorder %s1622_s14, %s2463_s29  ;;  %s2609_s27 = smov [#allocation10]  }
 0x261   : > { %s2467_s7 = sshll.u32 %s2609_s27, 4  ;;  %s2468_s7 = int_to_ptr.vmem [resolvable:$false] %s2467_s7 }
 0x262   : > { %p2465_p9 = pnand %p2464_p12, %p3135_p7  ;;  %s2469_s26 = scalar_lea.vmem %s2468_s7, 32 }
 0x263   : > { %s1862_s1 = sshll.u32 %s3133_s22, 4  ;;  %p2470_p3 = scmp.lt.s32.totalorder %s1622_s14, %s2468_s7 }
 0x264   : > { %s1619_s21 = scalar_lea.hbm %s3134_s28, %s1862_s1  ;;  %p2466_p5 = pneg %p2465_p9 }
 0x265   : > { %p2471_p8 = scmp.lt.s32.totalorder %s2469_s26, %s2463_s29 }
 0x267   : > { %p2472_p0 = por %p2471_p8, %p2470_p3 }
 0x269   : > { %p2473_p1 = pnand %p2472_p0, %p2466_p5 }
 0x26b   : > { %2476 = shalt.err (!%p2473_p1)
}
 0x26c   : > { %s2477_s9 = scalar_lea.hbm %s1619_s21, 16  ;;  %s2481_s12 = scalar_lea.hbm %s3134_s28, 64 }
 0x26d   : > { %p2478_p2 = scmp.ne.s32.totalorder %s1619_s21, %s2477_s9  ;;  %p2482_p10 = scmp.lt.s32.totalorder %s1619_s21, %s3134_s28 }
 0x26e   : > { %p2483_p13 = scmp.lt.s32.totalorder %s2481_s12, %s2477_s9 }
 0x26f   : > { %p2479_p11 = pnand %p2478_p2, %p3135_p7 }
 0x270   : > { %p2484_p6 = por %p2483_p13, %p2482_p10 }
 0x271   : > { %p2480_p4 = pneg %p2479_p11 }
 0x273   : > { %p2485_p12 = pnand %p2484_p6, %p2480_p4 }
 0x275   : > { %2488 = shalt.err (!%p2485_p12)
}
 0x276   : > { %2103 = dma.vmem_to_hbm [thread:$0]  (%p3135_p7), %s1622_s14, 16, %s1619_s21, %s1609_s5  }
 0x277 PF: > { %s3136_s22 = sld [smem:[#allocation16_spill]]  ;;  %p2128_p9 = scmp.ge.s32.totalorder %s2595_s25, 2 }
 0x278   : > { %s3137_s1 = sld [smem:[#allocation21_spill]] }
 0x27d   : > { %s1633_s4 = sand.u32 1, %s3136_s22  }
 0x27e   : > { %p3138_p5 = scmp.ne.s32.totalorder %s3137_s1, 0  ;;  %s1634_s8 = scalar_lea.sflag [#allocation5], %s1633_s4 }
 0x280   : > { %p2120_p3 = pnand %p2128_p9, %p3138_p5 }
 0x282   : > { %p2121_p8 = pneg %p2120_p3 }
 0x284   : > { %2550 = dma.done.wait (%p2121_p8), %s1634_s8, 16  }
 0x285   : > { %2552 = vsyncadd (%p2121_p8), %s1634_s8, 4294967280  ;;  %s21_s25 = sadd.s32 1, %s2595_s25   ;;  %s3139_s14 = sld [smem:[#allocation22_spill]] }
 0x286   : > { %p18_p0 = scmp.ge.s32.totalorder %s21_s25, 10   ;;  %s3140_s5 = sld [smem:[#allocation23_spill]] }
 0x287   : > { %s3141_s15 = smov %s2559_s16  ;;  %s3142_s16 = smov %s2563_s17 }
 0x288   : > { %s3143_s17 = smov %s2800_s18  ;;  %s3144_s18 = smov %s2571_s19 }
 0x289   : > { %s3145_s19 = smov %s2575_s20  ;;  %s3146_s20 = smov %s2768_s30 }
 0x28a   : > { %s3147_s21 = smov %s2587_s23  ;;  %s3148_s22 = smov %s2591_s24 }
 0x28b   : > { %s3149_s23 = smov %s3139_s14  ;;  %20 = sbr.rel (!%p18_p0) target bundleno = 13 (0xd), region = 109 }
 0x28c   : > { %s3150_s24 = smov %s3140_s5 }
 0x290   :  { %1638 = vsyncpa [#allocation4], 1 }
 0x291   :  { %1640 = vsyncpa [#allocation4 + $0x1], 1 }
 0x292   :  { %1641 = vsyncpa [#allocation7], 1 }
 0x293   :  { %1642 = vsyncpa [#allocation5], 1 }
 0x294   :  { %1644 = vsyncpa [#allocation5 + $0x1], 1 }

</bundles_post_ra>
